<compile_context>
chip_gen: v7x
topology: tpu7x:2x2x1
jax: 0.10.0
libtpu: 0.0.40
codegen_flags: <defaults>
</compile_context>

<pallas_src>
import jax
import jax.numpy as jnp
from jax import lax
from jax.experimental import pallas as pl
from jax.experimental.pallas import tpu as pltpu

_EDGE_TILE = 256   # edges per grid step (lane-dense one-hot tiles, fills 256-wide MXU)
_FEAT_PAD = 128    # lane-dense padded feature width for x / hidden / output


def _gnn_kernel(ei_ref, x_ref, wl_ref, wr_ref, b_ref, out_ref,
                h_scr, agg_scr, deg_scr):
    """Grid = (layer, edge_tile). Each step scatter-adds one edge tile's messages."""
    layer = pl.program_id(0)
    t = pl.program_id(1)
    last_t = pl.num_programs(1) - 1

    n = h_scr.shape[0]
    te = ei_ref.shape[1]

    # --- per-kernel init (first step of layer 0) ---
    @pl.when(jnp.logical_and(layer == 0, t == 0))
    def _():
        h_scr[...] = x_ref[...].astype(jnp.float32)
        deg_scr[...] = jnp.zeros_like(deg_scr)

    # --- per-layer init ---
    @pl.when(t == 0)
    def _():
        agg_scr[...] = jnp.zeros_like(agg_scr)

    # --- one edge tile: gather (MXU) + scatter-add (MXU) ---
    src = ei_ref[0:1, :]                                   # (1, TE) int32, sentinel n pads
    dst = ei_ref[1:2, :]                                   # (1, TE) int32
    node_iota = lax.broadcasted_iota(jnp.int32, (n, te), 0)
    s_oh = (node_iota == src).astype(jnp.float32)          # (n, TE): src[e] == j
    d_oh = (node_iota == dst).astype(jnp.float32)          # (n, TE): dst[e] == i

    # g[e, :] = h[src[e], :]   (padded edges -> all-zero rows)
    g = lax.dot_general(s_oh, h_scr[...], (((0,), (0,)), ((), ())),
                        preferred_element_type=jnp.float32)        # (TE, F)
    # agg[i, :] += sum_{e: dst[e]==i} g[e, :]
    agg_scr[...] += jnp.dot(d_oh, g, preferred_element_type=jnp.float32)

    # In-degree only depends on edges, not the layer: accumulate once (layer 0).
    @pl.when(layer == 0)
    def _():
        deg_scr[...] += jnp.sum(d_oh, axis=1, keepdims=True)       # (n, 1)

    # --- layer finalize: mean-normalize (row scale), two matmuls, bias ---
    def _linear():
        inv_deg = 1.0 / jnp.maximum(deg_scr[...], 1.0)             # exact divide, O(N)
        agg = agg_scr[...] * inv_deg                               # fold mean into scale
        return (jnp.dot(agg, wl_ref[0], preferred_element_type=jnp.float32)
                + jnp.dot(h_scr[...], wr_ref[0], preferred_element_type=jnp.float32)
                + b_ref[0])

    @pl.when(jnp.logical_and(t == last_t, layer == 0))
    def _():
        h_scr[...] = jnp.maximum(_linear(), 0.0)                   # ReLU -> layer-2 input

    @pl.when(jnp.logical_and(t == last_t, layer == 1))
    def _():
        out_ref[...] = _linear().astype(out_ref.dtype)


def gnn_forward(x, edge_index, params):
    n, f_in = x.shape
    hidden = params["w1_l"].shape[1]
    out_ch = params["w2_l"].shape[1]
    F = _FEAT_PAD
    assert f_in <= F and hidden <= F and out_ch <= F

    # Lane-dense padding (zero columns/rows keep the math exact).
    xp = jnp.zeros((n, F), jnp.float32).at[:, :f_in].set(x.astype(jnp.float32))

    def pad_w(w):
        r, c = w.shape
        return jnp.zeros((F, F), jnp.float32).at[:r, :c].set(w.astype(jnp.float32))

    def pad_b(b):
        return jnp.zeros((1, F), jnp.float32).at[0, :b.shape[0]].set(b.astype(jnp.float32))

    wl = jnp.stack([pad_w(params["w1_l"]), pad_w(params["w2_l"])])   # (2, F, F)
    wr = jnp.stack([pad_w(params["w1_r"]), pad_w(params["w2_r"])])   # (2, F, F)
    bb = jnp.stack([pad_b(params["b1"]), pad_b(params["b2"])])       # (2, 1, F)

    # Pad edges to a multiple of the edge tile; sentinel node index `n` never
    # matches any real node, so padded edges contribute nothing.
    e = edge_index.shape[1]
    e_pad = max(_EDGE_TILE, pl.cdiv(e, _EDGE_TILE) * _EDGE_TILE)
    ei = jnp.full((2, e_pad), n, dtype=jnp.int32).at[:, :e].set(
        edge_index.astype(jnp.int32))
    n_tiles = e_pad // _EDGE_TILE

    grid_spec = pltpu.PrefetchScalarGridSpec(
        num_scalar_prefetch=0,
        grid=(2, n_tiles),                                   # (layer, edge tile)
        in_specs=[
            pl.BlockSpec((2, _EDGE_TILE), lambda l, t: (0, t)),   # edge_index tile
            pl.BlockSpec((n, F), lambda l, t: (0, 0)),            # x (resident)
            pl.BlockSpec((1, F, F), lambda l, t: (l, 0, 0)),      # W_l of layer l
            pl.BlockSpec((1, F, F), lambda l, t: (l, 0, 0)),      # W_r of layer l
            pl.BlockSpec((1, 1, F), lambda l, t: (l, 0, 0)),      # b   of layer l
        ],
        out_specs=pl.BlockSpec((n, F), lambda l, t: (0, 0)),      # lane-dense output slab
        scratch_shapes=[
            pltpu.VMEM((n, F), jnp.float32),   # current layer input (x, then h1)
            pltpu.VMEM((n, F), jnp.float32),   # aggregate accumulator
            pltpu.VMEM((n, 1), jnp.float32),   # in-degree accumulator
        ],
    )

    # TODO(synk): on v7x, a leading "parallel" grid axis over destination-row
    # blocks would use both TensorCores; omitted here to keep one accumulator.
    out_pad = pl.pallas_call(
        _gnn_kernel,
        out_shape=jax.ShapeDtypeStruct((n, F), x.dtype),
        grid_spec=grid_spec,
        compiler_params=pltpu.CompilerParams(
            dimension_semantics=("arbitrary", "arbitrary"),   # layer & edge axes are sequential
            vmem_limit_bytes=32 * 1024 * 1024),
    )(ei, xp, wl, wr, bb)

    return out_pad[:, :out_ch]


def reference(x, edge_index, params):
    """Pure-JAX mirror of PyG SAGEConv (mean aggr, root weight, bias) x2 + ReLU."""
    n = x.shape[0]
    src, dst = edge_index[0], edge_index[1]

    def sage(x_in, w_l, b_l, w_r):
        msgs = x_in[src]                                              # (E, F)
        agg_sum = jnp.zeros((n, x_in.shape[1]), x_in.dtype).at[dst].add(msgs)
        deg = jnp.zeros((n,), x_in.dtype).at[dst].add(1.0)
        agg = agg_sum / jnp.maximum(deg, 1.0)[:, None]
        return agg @ w_l + b_l + x_in @ w_r

    h1 = jax.nn.relu(sage(x, params["w1_l"], params["b1"], params["w1_r"]))
    return sage(h1, params["w2_l"], params["b2"], params["w2_r"])


if __name__ == "__main__":
    N, F_IN, HIDDEN, OUT, E = 64, 32, 64, 32, 200

    key = jax.random.PRNGKey(0)
    k = jax.random.split(key, 8)

    x = jax.random.normal(k[0], (N, F_IN), jnp.float32)
    edge_index = jax.random.randint(k[1], (2, E), 0, N, dtype=jnp.int32)

    params = {
        "w1_l": 0.1 * jax.random.normal(k[2], (F_IN, HIDDEN), jnp.float32),
        "w1_r": 0.1 * jax.random.normal(k[3], (F_IN, HIDDEN), jnp.float32),
        "b1":   0.1 * jax.random.normal(k[4], (HIDDEN,), jnp.float32),
        "w2_l": 0.1 * jax.random.normal(k[5], (HIDDEN, OUT), jnp.float32),
        "w2_r": 0.1 * jax.random.normal(k[6], (HIDDEN, OUT), jnp.float32),
        "b2":   0.1 * jax.random.normal(k[7], (OUT,), jnp.float32),
    }

    out = gnn_forward(x, edge_index, params)
    out = jax.block_until_ready(out)

    ref = reference(x, edge_index, params)
    err = float(jnp.max(jnp.abs(out - ref)))
    assert jnp.allclose(out, ref, atol=1e-3, rtol=1e-3), f"max abs err = {err}"

    print("KERNEL_OK")
</pallas_src>

<mosaic_0001>
module attributes {stable_mosaic.version = 11 : i64} {
  func.func @_gnn_kernel(%arg0: i32, %arg1: i32, %arg2: memref<2x256xi32, #tpu.memory_space<vmem>>, %arg3: memref<64x128xf32, #tpu.memory_space<vmem>>, %arg4: memref<1x128x128xf32, #tpu.memory_space<vmem>>, %arg5: memref<1x128x128xf32, #tpu.memory_space<vmem>>, %arg6: memref<1x1x128xf32, #tpu.memory_space<vmem>>, %arg7: memref<64x128xf32, #tpu.memory_space<vmem>>, %arg8: memref<64x128xf32, #tpu.memory_space<vmem>>, %arg9: memref<64x128xf32, #tpu.memory_space<vmem>>, %arg10: memref<64x1xf32, #tpu.memory_space<vmem>>) attributes {dimension_semantics = [#tpu.dimension_semantics<arbitrary>, #tpu.dimension_semantics<arbitrary>], iteration_bounds = array<i64: 2, 1>, scalar_prefetch = 0 : i64, scratch_operands = 3 : i64, tpu.core_type = #tpu.core_type<tc>, window_params = [{transform_indices = @transform_0, window_bounds = array<i64: 2, 256>}, {pipeline_mode = #tpu.pipeline_mode<synchronous>, transform_indices = @transform_1, window_bounds = array<i64: 64, 128>}, {transform_indices = @transform_2, window_bounds = array<i64: 1, 128, 128>}, {transform_indices = @transform_3, window_bounds = array<i64: 1, 128, 128>}, {transform_indices = @transform_4, window_bounds = array<i64: 1, 1, 128>}, {pipeline_mode = #tpu.pipeline_mode<synchronous>, transform_indices = @transform_5, window_bounds = array<i64: 64, 128>}]} {
    %c0_i32 = arith.constant 0 : i32
    %0 = arith.cmpi eq, %arg0, %c0_i32 : i32
    %c0_i32_0 = arith.constant 0 : i32
    %1 = arith.cmpi eq, %arg1, %c0_i32_0 : i32
    %2 = arith.andi %0, %1 : i1
    %3 = arith.extui %2 : i1 to i32
    %c0_i32_1 = arith.constant 0 : i32
    %4 = arith.cmpi ne, %3, %c0_i32_1 : i32
    scf.if %4 {
      %c0_20 = arith.constant 0 : index
      %c0_21 = arith.constant 0 : index
      %38 = vector.load %arg3[%c0_20, %c0_21] : memref<64x128xf32, #tpu.memory_space<vmem>>, vector<64x128xf32>
      %c0_22 = arith.constant 0 : index
      %c0_23 = arith.constant 0 : index
      %39 = vector.load %arg8[%c0_22, %c0_23] : memref<64x128xf32, #tpu.memory_space<vmem>>, vector<64x128xf32>
      tpu.vector_store %arg8[%c0_22, %c0_23], %38 {strides = array<i32>} : memref<64x128xf32, #tpu.memory_space<vmem>>, vector<64x128xf32>,
      %cst_24 = arith.constant 0.000000e+00 : f32
      %40 = vector.broadcast %cst_24 : f32 to vector<64x1xf32>
      %c0_25 = arith.constant 0 : index
      %c0_26 = arith.constant 0 : index
      %41 = vector.load %arg10[%c0_25, %c0_26] : memref<64x1xf32, #tpu.memory_space<vmem>>, vector<64x1xf32>
      tpu.vector_store %arg10[%c0_25, %c0_26], %40 {strides = array<i32>} : memref<64x1xf32, #tpu.memory_space<vmem>>, vector<64x1xf32>,
    } else {
    }
    %c0_i32_2 = arith.constant 0 : i32
    %5 = arith.cmpi eq, %arg1, %c0_i32_2 : i32
    %6 = arith.extui %5 : i1 to i32
    %c0_i32_3 = arith.constant 0 : i32
    %7 = arith.cmpi ne, %6, %c0_i32_3 : i32
    scf.if %7 {
      %cst_20 = arith.constant 0.000000e+00 : f32
      %38 = vector.broadcast %cst_20 : f32 to vector<64x128xf32>
      %c0_21 = arith.constant 0 : index
      %c0_22 = arith.constant 0 : index
      %39 = vector.load %arg9[%c0_21, %c0_22] : memref<64x128xf32, #tpu.memory_space<vmem>>, vector<64x128xf32>
      tpu.vector_store %arg9[%c0_21, %c0_22], %38 {strides = array<i32>} : memref<64x128xf32, #tpu.memory_space<vmem>>, vector<64x128xf32>,
    } else {
    }
    %c0 = arith.constant 0 : index
    %c0_4 = arith.constant 0 : index
    %8 = vector.load %arg2[%c0, %c0_4] : memref<2x256xi32, #tpu.memory_space<vmem>>, vector<1x256xi32>
    %c1 = arith.constant 1 : index
    %c0_5 = arith.constant 0 : index
    %9 = vector.load %arg2[%c1, %c0_5] : memref<2x256xi32, #tpu.memory_space<vmem>>, vector<1x256xi32>
    %10 = tpu.iota {dimensions = array<i32: 0>} : vector<64x256xi32>
    %11 = vector.broadcast %8 : vector<1x256xi32> to vector<64x256xi32>
    %12 = arith.cmpi eq, %10, %11 : vector<64x256xi32>
    %13 = arith.extui %12 : vector<64x256xi1> to vector<64x256xi32>
    %14 = arith.sitofp %13 : vector<64x256xi32> to vector<64x256xf32>
    %15 = vector.broadcast %9 : vector<1x256xi32> to vector<64x256xi32>
    %16 = arith.cmpi eq, %10, %15 : vector<64x256xi32>
    %17 = arith.extui %16 : vector<64x256xi1> to vector<64x256xi32>
    %18 = arith.sitofp %17 : vector<64x256xi32> to vector<64x256xf32>
    %c0_6 = arith.constant 0 : index
    %c0_7 = arith.constant 0 : index
    %19 = vector.load %arg8[%c0_6, %c0_7] : memref<64x128xf32, #tpu.memory_space<vmem>>, vector<64x128xf32>
    %cst = arith.constant dense<0.000000e+00> : vector<256x128xf32>
    %20 = tpu.matmul %14, %19, %cst {dimension_numbers = #tpu.dot_dimension_numbers<[0], [0], [1], [1], [0, 1, 1, 1], [], []>} : vector<64x256xf32>, vector<64x128xf32>, vector<256x128xf32> -> vector<256x128xf32>
    %c0_8 = arith.constant 0 : index
    %c0_9 = arith.constant 0 : index
    %21 = vector.load %arg9[%c0_8, %c0_9] : memref<64x128xf32, #tpu.memory_space<vmem>>, vector<64x128xf32>
    %cst_10 = arith.constant dense<0.000000e+00> : vector<64x128xf32>
    %22 = tpu.matmul %18, %20, %cst_10 {dimension_numbers = #tpu.dot_dimension_numbers<[1], [0], [0], [1], [0, 0, 1, 1], [], []>} : vector<64x256xf32>, vector<256x128xf32>, vector<64x128xf32> -> vector<64x128xf32>
    %23 = arith.addf %21, %22 : vector<64x128xf32>
    %c0_11 = arith.constant 0 : index
    %c0_12 = arith.constant 0 : index
    %24 = vector.load %arg9[%c0_11, %c0_12] : memref<64x128xf32, #tpu.memory_space<vmem>>, vector<64x128xf32>
    tpu.vector_store %arg9[%c0_11, %c0_12], %23 {strides = array<i32>} : memref<64x128xf32, #tpu.memory_space<vmem>>, vector<64x128xf32>,
    %c0_i32_13 = arith.constant 0 : i32
    %25 = arith.cmpi eq, %arg0, %c0_i32_13 : i32
    %26 = arith.extui %25 : i1 to i32
    %c0_i32_14 = arith.constant 0 : i32
    %27 = arith.cmpi ne, %26, %c0_i32_14 : i32
    scf.if %27 {
      %c0_20 = arith.constant 0 : index
      %c0_21 = arith.constant 0 : index
      %38 = vector.load %arg10[%c0_20, %c0_21] : memref<64x1xf32, #tpu.memory_space<vmem>>, vector<64x1xf32>
      %cst_22 = arith.constant dense<0.000000e+00> : vector<64xf32>
      %39 = vector.multi_reduction <add>, %18, %cst_22 [1] : vector<64x256xf32> to vector<64xf32>
      %40 = vector.shape_cast %39 : vector<64xf32> to vector<64x1xf32>
      %41 = arith.addf %38, %40 : vector<64x1xf32>
      %c0_23 = arith.constant 0 : index
      %c0_24 = arith.constant 0 : index
      %42 = vector.load %arg10[%c0_23, %c0_24] : memref<64x1xf32, #tpu.memory_space<vmem>>, vector<64x1xf32>
      tpu.vector_store %arg10[%c0_23, %c0_24], %41 {strides = array<i32>} : memref<64x1xf32, #tpu.memory_space<vmem>>, vector<64x1xf32>,
    } else {
    }
    %c0_i32_15 = arith.constant 0 : i32
    %28 = arith.cmpi eq, %arg1, %c0_i32_15 : i32
    %c0_i32_16 = arith.constant 0 : i32
    %29 = arith.cmpi eq, %arg0, %c0_i32_16 : i32
    %30 = arith.andi %28, %29 : i1
    %31 = arith.extui %30 : i1 to i32
    %c0_i32_17 = arith.constant 0 : i32
    %32 = arith.cmpi ne, %31, %c0_i32_17 : i32
    scf.if %32 {
      %c0_20 = arith.constant 0 : index
      %c0_21 = arith.constant 0 : index
      %38 = vector.load %arg10[%c0_20, %c0_21] : memref<64x1xf32, #tpu.memory_space<vmem>>, vector<64x1xf32>
      %cst_22 = arith.constant 1.000000e+00 : f32
      %39 = vector.broadcast %cst_22 : f32 to vector<64x1xf32>
      %40 = arith.maximumf %38, %39 : vector<64x1xf32>
      %cst_23 = arith.constant 1.000000e+00 : f32
      %41 = vector.broadcast %cst_23 : f32 to vector<64x1xf32>
      %42 = arith.divf %41, %40 : vector<64x1xf32>
      %c0_24 = arith.constant 0 : index
      %c0_25 = arith.constant 0 : index
      %43 = vector.load %arg9[%c0_24, %c0_25] : memref<64x128xf32, #tpu.memory_space<vmem>>, vector<64x128xf32>
      %44 = vector.broadcast %42 : vector<64x1xf32> to vector<64x128xf32>
      %45 = arith.mulf %43, %44 : vector<64x128xf32>
      %c0_26 = arith.constant 0 : index
      %c0_27 = arith.constant 0 : index
      %c0_28 = arith.constant 0 : index
      %46 = vector.load %arg4[%c0_26, %c0_27, %c0_28] : memref<1x128x128xf32, #tpu.memory_space<vmem>>, vector<1x128x128xf32>
      %47 = vector.shape_cast %46 : vector<1x128x128xf32> to vector<128x128xf32>
      %cst_29 = arith.constant dense<0.000000e+00> : vector<64x128xf32>
      %48 = tpu.matmul %45, %47, %cst_29 {dimension_numbers = #tpu.dot_dimension_numbers<[1], [0], [0], [1], [0, 0, 1, 1], [], []>} : vector<64x128xf32>, vector<128x128xf32>, vector<64x128xf32> -> vector<64x128xf32>
      %c0_30 = arith.constant 0 : index
      %c0_31 = arith.constant 0 : index
      %49 = vector.load %arg8[%c0_30, %c0_31] : memref<64x128xf32, #tpu.memory_space<vmem>>, vector<64x128xf32>
      %c0_32 = arith.constant 0 : index
      %c0_33 = arith.constant 0 : index
      %c0_34 = arith.constant 0 : index
      %50 = vector.load %arg5[%c0_32, %c0_33, %c0_34] : memref<1x128x128xf32, #tpu.memory_space<vmem>>, vector<1x128x128xf32>
      %51 = vector.shape_cast %50 : vector<1x128x128xf32> to vector<128x128xf32>
      %cst_35 = arith.constant dense<0.000000e+00> : vector<64x128xf32>
      %52 = tpu.matmul %49, %51, %cst_35 {dimension_numbers = #tpu.dot_dimension_numbers<[1], [0], [0], [1], [0, 0, 1, 1], [], []>} : vector<64x128xf32>, vector<128x128xf32>, vector<64x128xf32> -> vector<64x128xf32>
      %53 = arith.addf %48, %52 : vector<64x128xf32>
      %c0_36 = arith.constant 0 : index
      %c0_37 = arith.constant 0 : index
      %c0_38 = arith.constant 0 : index
      %54 = vector.load %arg6[%c0_36, %c0_37, %c0_38] : memref<1x1x128xf32, #tpu.memory_space<vmem>>, vector<1x1x128xf32>
      %55 = vector.shape_cast %54 : vector<1x1x128xf32> to vector<1x128xf32>
      %56 = vector.broadcast %55 : vector<1x128xf32> to vector<64x128xf32>
      %57 = arith.addf %53, %56 : vector<64x128xf32>
      %cst_39 = arith.constant 0.000000e+00 : f32
      %58 = vector.broadcast %cst_39 : f32 to vector<64x128xf32>
      %59 = arith.maximumf %57, %58 : vector<64x128xf32>
      %c0_40 = arith.constant 0 : index
      %c0_41 = arith.constant 0 : index
      %60 = vector.load %arg8[%c0_40, %c0_41] : memref<64x128xf32, #tpu.memory_space<vmem>>, vector<64x128xf32>
      tpu.vector_store %arg8[%c0_40, %c0_41], %59 {strides = array<i32>} : memref<64x128xf32, #tpu.memory_space<vmem>>, vector<64x128xf32>,
    } else {
    }
    %c0_i32_18 = arith.constant 0 : i32
    %33 = arith.cmpi eq, %arg1, %c0_i32_18 : i32
    %c1_i32 = arith.constant 1 : i32
    %34 = arith.cmpi eq, %arg0, %c1_i32 : i32
    %35 = arith.andi %33, %34 : i1
    %36 = arith.extui %35 : i1 to i32
    %c0_i32_19 = arith.constant 0 : i32
    %37 = arith.cmpi ne, %36, %c0_i32_19 : i32
    scf.if %37 {
      %c0_20 = arith.constant 0 : index
      %c0_21 = arith.constant 0 : index
      %38 = vector.load %arg10[%c0_20, %c0_21] : memref<64x1xf32, #tpu.memory_space<vmem>>, vector<64x1xf32>
      %cst_22 = arith.constant 1.000000e+00 : f32
      %39 = vector.broadcast %cst_22 : f32 to vector<64x1xf32>
      %40 = arith.maximumf %38, %39 : vector<64x1xf32>
      %cst_23 = arith.constant 1.000000e+00 : f32
      %41 = vector.broadcast %cst_23 : f32 to vector<64x1xf32>
      %42 = arith.divf %41, %40 : vector<64x1xf32>
      %c0_24 = arith.constant 0 : index
      %c0_25 = arith.constant 0 : index
      %43 = vector.load %arg9[%c0_24, %c0_25] : memref<64x128xf32, #tpu.memory_space<vmem>>, vector<64x128xf32>
      %44 = vector.broadcast %42 : vector<64x1xf32> to vector<64x128xf32>
      %45 = arith.mulf %43, %44 : vector<64x128xf32>
      %c0_26 = arith.constant 0 : index
      %c0_27 = arith.constant 0 : index
      %c0_28 = arith.constant 0 : index
      %46 = vector.load %arg4[%c0_26, %c0_27, %c0_28] : memref<1x128x128xf32, #tpu.memory_space<vmem>>, vector<1x128x128xf32>
      %47 = vector.shape_cast %46 : vector<1x128x128xf32> to vector<128x128xf32>
      %cst_29 = arith.constant dense<0.000000e+00> : vector<64x128xf32>
      %48 = tpu.matmul %45, %47, %cst_29 {dimension_numbers = #tpu.dot_dimension_numbers<[1], [0], [0], [1], [0, 0, 1, 1], [], []>} : vector<64x128xf32>, vector<128x128xf32>, vector<64x128xf32> -> vector<64x128xf32>
      %c0_30 = arith.constant 0 : index
      %c0_31 = arith.constant 0 : index
      %49 = vector.load %arg8[%c0_30, %c0_31] : memref<64x128xf32, #tpu.memory_space<vmem>>, vector<64x128xf32>
      %c0_32 = arith.constant 0 : index
      %c0_33 = arith.constant 0 : index
      %c0_34 = arith.constant 0 : index
      %50 = vector.load %arg5[%c0_32, %c0_33, %c0_34] : memref<1x128x128xf32, #tpu.memory_space<vmem>>, vector<1x128x128xf32>
      %51 = vector.shape_cast %50 : vector<1x128x128xf32> to vector<128x128xf32>
      %cst_35 = arith.constant dense<0.000000e+00> : vector<64x128xf32>
      %52 = tpu.matmul %49, %51, %cst_35 {dimension_numbers = #tpu.dot_dimension_numbers<[1], [0], [0], [1], [0, 0, 1, 1], [], []>} : vector<64x128xf32>, vector<128x128xf32>, vector<64x128xf32> -> vector<64x128xf32>
      %53 = arith.addf %48, %52 : vector<64x128xf32>
      %c0_36 = arith.constant 0 : index
      %c0_37 = arith.constant 0 : index
      %c0_38 = arith.constant 0 : index
      %54 = vector.load %arg6[%c0_36, %c0_37, %c0_38] : memref<1x1x128xf32, #tpu.memory_space<vmem>>, vector<1x1x128xf32>
      %55 = vector.shape_cast %54 : vector<1x1x128xf32> to vector<1x128xf32>
      %56 = vector.broadcast %55 : vector<1x128xf32> to vector<64x128xf32>
      %57 = arith.addf %53, %56 : vector<64x128xf32>
      %c0_39 = arith.constant 0 : index
      %c0_40 = arith.constant 0 : index
      %58 = vector.load %arg7[%c0_39, %c0_40] : memref<64x128xf32, #tpu.memory_space<vmem>>, vector<64x128xf32>
      tpu.vector_store %arg7[%c0_39, %c0_40], %57 {strides = array<i32>} : memref<64x128xf32, #tpu.memory_space<vmem>>, vector<64x128xf32>,
    } else {
    }
    return
  }
  func.func @transform_0(%arg0: i32, %arg1: i32) -> (i32, i32) {
    %c0_i32 = arith.constant 0 : i32
    %c0_i32_0 = arith.constant 0 : i32
    return %c0_i32, %arg1 : i32, i32
  }
  func.func @transform_1(%arg0: i32, %arg1: i32) -> (i32, i32) {
    %c0_i32 = arith.constant 0 : i32
    %c0_i32_0 = arith.constant 0 : i32
    %c0_i32_1 = arith.constant 0 : i32
    return %c0_i32, %c0_i32_0 : i32, i32
  }
  func.func @transform_2(%arg0: i32, %arg1: i32) -> (i32, i32, i32) {
    %c0_i32 = arith.constant 0 : i32
    %c0_i32_0 = arith.constant 0 : i32
    %c0_i32_1 = arith.constant 0 : i32
    return %arg0, %c0_i32, %c0_i32_0 : i32, i32, i32
  }
  func.func @transform_3(%arg0: i32, %arg1: i32) -> (i32, i32, i32) {
    %c0_i32 = arith.constant 0 : i32
    %c0_i32_0 = arith.constant 0 : i32
    %c0_i32_1 = arith.constant 0 : i32
    return %arg0, %c0_i32, %c0_i32_0 : i32, i32, i32
  }
  func.func @transform_4(%arg0: i32, %arg1: i32) -> (i32, i32, i32) {
    %c0_i32 = arith.constant 0 : i32
    %c0_i32_0 = arith.constant 0 : i32
    %c0_i32_1 = arith.constant 0 : i32
    return %arg0, %c0_i32, %c0_i32_0 : i32, i32, i32
  }
  func.func @transform_5(%arg0: i32, %arg1: i32) -> (i32, i32) {
    %c0_i32 = arith.constant 0 : i32
    %c0_i32_0 = arith.constant 0 : i32
    %c0_i32_1 = arith.constant 0 : i32
    return %c0_i32, %c0_i32_0 : i32, i32
  }
}

</mosaic_0001>

<bundles_post_ra>
// kernel: tpu_custom_call.1
= control target key start
LH: loop header
LB: loop body
LE: loop exit
PB: predicated region body
PF: predicated region fallthrough
CT: control target
= control target key end

     0   :  { %s3692_s0 = inlined_call_operand.hbm [shape: s32[2,256], index: 0, kind: input, shape index: {}]   ;;  %s3693_s1 = inlined_call_operand.hbm [shape: f32[64,128], index: 1, kind: input, shape index: {}]   ;;  %s3694_s2 = inlined_call_operand.hbm [shape: f32[2,128,128], index: 2, kind: input, shape index: {}]   ;;  %s3695_s3 = inlined_call_operand.hbm [shape: f32[2,128,128], index: 3, kind: input, shape index: {}]   ;;  %s3696_s4 = inlined_call_operand.vmem [shape: f32[2,1,128], index: 4, kind: input, shape index: {}]   ;;  %s3697_s5 = inlined_call_operand.hbm [shape: f32[64,128], index: 5, kind: output, shape index: {}]  }
   0x1   :  { %3706 = sst [smem:[#allocation19_spill]] %s3692_s0 }
   0x2   :  { %3707 = sst [smem:[#allocation20_spill]] %s3694_s2 }
   0x3   :  { %10 = vsyncpa [#allocation6], 0 }
   0x4   :  { %11 = vsyncpa [#allocation9], 0 }
   0x5   :  { %12 = vsyncpa [#allocation7], 0  ;;  %s3040_s18 = smov 0   ;;  %s3042_s19 = smov 0  }
   0x6   :  { %s3044_s20 = smov 0   ;;  %s3046_s21 = smov 0  }
   0x7   :  { %s3048_s22 = smov 0   ;;  %s3050_s23 = smov 0  }
   0x8 LB: > { %s3069_s24 = sadd.s32 4294967295, %s2994_s23   ;;  %s84_s25 = sadd.s32 1, %s2982_s20  ;;  %s2994_s23 = sphi %s3050_s23, %s18_s23   ;;  %s2990_s22 = sphi %s3048_s22, %s3734_s22   ;;  %s2986_s21 = sphi %s3046_s21, %s3733_s21   ;;  %s2982_s20 = sphi %s3044_s20, %s3732_s20   ;;  %s2978_s19 = sphi %s3042_s19, %s3731_s19   ;;  %s2974_s18 = sphi %s3040_s18, %s3730_s18  }
   0x9   : > { %p91_p0 = scmp.ne.s32.totalorder %s2982_s20, %s2978_s19  ;;  %p92_p1 = scmp.eq.s32.totalorder %s2994_s23, 0 }
   0xa   : > { %p97_p2 = scmp.ne.s32.totalorder %s2978_s19, %s2974_s18  ;;  %p3698_p3 = scmp.eq.s32.totalorder %s3069_s24, 0 }
   0xb   : > { %p93_p4 = por %p92_p1, %p91_p0  ;;  %p1925_p5 = scmp.ge.s32.totalorder %s2994_s23, 1 }
   0xc   : > { %p3080_p6 = por %p3698_p3, %p97_p2  ;;  %p181_p7 = scmp.lt.s32.totalorder %s2994_s23, 3 }
   0xd   : > { %s2996_s28 = smov [#allocation5]   ;;  %p2689_p10 = scmp.lt.s32.totalorder %s2994_s23, 2 }
   0xe   : > { %s3708_s26 = scalar_select %p3080_p6, 1, 0 }
   0xf   : > { %p3085_p8 = pnand %p1925_p5, %p181_p7  ;;  %s197_s29 = sshll.u32 %s2996_s28, 4  ;;  %s198_s29 = int_to_ptr.vmem [resolvable:$true] %s197_s29 }
  0x10   : > { %p3098_p12 = pnand %p2689_p10, %p93_p4  ;;  %s3712_s0 = sld [smem:[#allocation19_spill]] }
  0x11   : > { %s3709_s27 = scalar_select %p3085_p8, 1, 0 }
  0x12   : > { %p2673_p9 = pneg %p3085_p8 }
  0x13   : > { %s3711_s6 = scalar_select %p3098_p12, 1, 0 }
  0x14   : > { %p3094_p11 = pnand %p2673_p9, %p3698_p3 }
  0x16   : > { %s2790_s9 = scalar_lea.hbm %s3712_s0, 64  ;;  %p3702_p0 = pneg %p3094_p11 }
  0x17   : > { %p2791_p13 = scmp.ne.s32.totalorder %s3712_s0, %s2790_s9  ;;  %p2797_p4 = scmp.lt.u32.totalorder %s2790_s9, %s3712_s0 }
  0x19   : > { %p2793_p1 = pnand %p3702_p0, %p2791_p13 }
  0x1b   : > { %p2794_p2 = pneg %p2793_p1 }
  0x1d   : > { %p2799_p5 = pnand %p2797_p4, %p2794_p2 }
  0x1f   : > { %2802 = shalt.err (!%p2799_p5)
}
  0x20   : > { %s2803_s14 = scalar_lea.vmem %s198_s29, 64  ;;  %p2811_p3 = scmp.lt.s32.totalorder %s198_s29, %s198_s29 }
  0x21   : > { %p2804_p7 = scmp.ne.s32.totalorder %s198_s29, %s2803_s14  ;;  %p2812_p6 = scmp.lt.s32.totalorder %s2803_s14, %s2803_s14 }
  0x23   : > { %p2806_p9 = pnand %p2804_p7, %p3702_p0  ;;  %p2813_p8 = por %p2812_p6, %p2811_p3 }
  0x25   : > { %p2807_p10 = pneg %p2806_p9 }
  0x27   : > { %p2814_p12 = pnand %p2813_p8, %p2807_p10 }
  0x29   : > { %2817 = shalt.err (!%p2814_p12)
}
  0x2a   : > { %2676 = dma.hbm_to_vmem [thread:$0]  (!%p3094_p11), %s3712_s0, 64, %s198_s29, [#allocation6]  }
  0x2b   : > { %s30_s17 = sadd.s32 1, %s2990_s22  ;;  %s221_s18 = sand.u32 1, %s2994_s23  }
  0x2c   : > { %p32_p3 = scmp.ge.s32.totalorder %s30_s17, 2  ;;  %s223_s28 = sand.u32 1, %s2982_s20  }
  0x2d   : > { %s2029_s7 = sshll.u32 %s2990_s22, 11  ;;  %s3130_s8 = sshll.u32 %s223_s28, 7 }
  0x2e   : > { %s3736_s17 = smov (%p32_p3, %s30_s17), 0  ;;  %s3714_s2 = sld [smem:[#allocation20_spill]] }
  0x2f   : > { %3713 = sst [smem:[#allocation17_spill]] %s3736_s17  ;;  %s81_s29 = ssub.s32 %s2990_s22, %s3736_s17 }
  0x30   : > { %p82_p6 = scmp.eq.s32.totalorder %s81_s29, 0  ;;  %s225_s12 = scalar_lea.vmem [#allocation10], %s3130_s8 }
  0x31   : > { %s232_s13 = sshll.u32 %s225_s12, 4  ;;  %s3149_s15 = scalar_lea.sflag [#allocation6], %s221_s18  ;;  %s3142_s13 = int_to_ptr.vmem [resolvable:$true] %s232_s13 }
  0x32   : > { %s3147_s14 = scalar_select %p82_p6, %s2982_s20, %s84_s25  }
  0x33   : > { %p3716_p12 = scmp.ne.s32.totalorder %s3711_s6, 0 }
  0x34   : > { %s3137_s11 = scalar_lea.hbm %s3714_s2, %s2029_s7  ;;  %3715 = sst [smem:[#allocation18_spill]] %s3147_s14 }
  0x35   : > { %s2818_s16 = scalar_lea.hbm %s3137_s11, 2048  ;;  %p3704_p13 = pneg %p3716_p12 }
  0x36   : > { %p2819_p8 = scmp.ne.s32.totalorder %s3137_s11, %s2818_s16  ;;  %s2823_s10 = scalar_lea.hbm %s3714_s2, 4096 }
  0x37   : > { %p2824_p4 = scmp.lt.u32.totalorder %s3137_s11, %s3714_s2  ;;  %p2825_p5 = scmp.lt.u32.totalorder %s2823_s10, %s2818_s16 }
  0x38   : > { %p2821_p1 = pnand %p3704_p13, %p2819_p8  ;;  %p2827_p9 = scmp.lt.u32.totalorder %s2818_s16, %s3137_s11 }
  0x39   : > { %p2826_p7 = por %p2825_p5, %p2824_p4 }
  0x3a   : > { %p2822_p2 = pneg %p2821_p1 }
  0x3b   : > { %p2828_p10 = por %p2827_p9, %p2826_p7 }
  0x3d   : > { %p2829_p3 = pnand %p2828_p10, %p2822_p2 }
  0x3f   : > { %2832 = shalt.err (!%p2829_p3)
}
  0x40   : > { %s2833_s25 = scalar_lea.vmem %s3142_s13, 2048  ;;  %s2997_s18 = smov [#allocation10]  }
  0x41   : > { %p2834_p6 = scmp.ne.s32.totalorder %s3142_s13, %s2833_s25  ;;  %s2838_s28 = sshll.u32 %s2997_s18, 4  ;;  %s2839_s28 = int_to_ptr.vmem [resolvable:$false] %s2838_s28 }
  0x42   : > { %s2840_s9 = scalar_lea.vmem %s2839_s28, 4096  ;;  %p2841_p0 = scmp.lt.s32.totalorder %s3142_s13, %s2839_s28 }
  0x43   : > { %p2836_p8 = pnand %p2834_p6, %p3704_p13  ;;  %p2842_p4 = scmp.lt.s32.totalorder %s2840_s9, %s2833_s25 }
  0x45   : > { %p2837_p1 = pneg %p2836_p8  ;;  %p2843_p5 = por %p2842_p4, %p2841_p0 }
  0x47   : > { %p2844_p7 = pnand %p2843_p5, %p2837_p1 }
  0x49   : > { %2847 = shalt.err (!%p2844_p7)
}
  0x4a   : > { %s2998_s16 = smov 128   ;;  %s2999_s10 = smov 8  }
  0x4b   : > { %2683 = dma.hbm_to_vmem [thread:$0]  (!%p3716_p12), %s3137_s11, 2048, %s3142_s13, %s3149_s15, %s2998_s16, %s2998_s16, %s2999_s10  }
  0x4c   : > { %s3000_s29 = smov [#allocation8]   ;;  %s3185_s28 = scalar_lea.hbm %s3695_s3, %s2029_s7 }
  0x4d   : > { %s207_s12 = sshll.u32 %s3000_s29, 4  ;;  %s2848_s2 = scalar_lea.hbm %s3693_s1, 1024  ;;  %s208_s12 = int_to_ptr.vmem [resolvable:$true] %s207_s12 }
  0x4e   : > { %p2849_p0 = scmp.ne.s32.totalorder %s3693_s1, %s2848_s2  ;;  %p3717_p2 = pneg %p3094_p11 }
  0x4f   : > { %p2855_p3 = scmp.lt.u32.totalorder %s2848_s2, %s3693_s1 }
  0x50   : > { %p2851_p9 = pnand %p2849_p0, %p3717_p2 }
  0x52   : > { %p2852_p10 = pneg %p2851_p9 }
  0x54   : > { %p2857_p6 = pnand %p2855_p3, %p2852_p10 }
  0x56   : > { %2860 = shalt.err (!%p2857_p6)
}
  0x57   : > { %s2861_s7 = scalar_lea.vmem %s208_s12, 1024  ;;  %p3718_p1 = pmov %p3717_p2 }
  0x58   : > { %p2862_p8 = scmp.ne.s32.totalorder %s208_s12, %s2861_s7  ;;  %p2869_p7 = scmp.lt.s32.totalorder %s208_s12, %s208_s12 }
  0x59   : > { %p2870_p13 = scmp.lt.s32.totalorder %s2861_s7, %s2861_s7 }
  0x5a   : > { %p2864_p4 = pnand %p2862_p8, %p3718_p1 }
  0x5b   : > { %p2871_p12 = por %p2870_p13, %p2869_p7 }
  0x5c   : > { %p2865_p5 = pneg %p2864_p4 }
  0x5e   : > { %p2872_p0 = pnand %p2871_p12, %p2865_p5 }
  0x60   : > { %2875 = shalt.err (!%p2872_p0)
}
  0x61   : > { %2679 = dma.hbm_to_vmem [thread:$0]  (!%p3094_p11), %s3693_s1, 1024, %s208_s12, [#allocation9], %s2998_s16, %s2998_s16, %s2999_s10  }
  0x62   : > { %s246_s17 = scalar_lea.vmem [#allocation11], %s3130_s8  ;;  %s2876_s29 = scalar_lea.hbm %s3185_s28, 2048 }
  0x63   : > { %s253_s14 = sshll.u32 %s246_s17, 4  ;;  %p2877_p12 = scmp.ne.s32.totalorder %s3185_s28, %s2876_s29  ;;  %s3211_s14 = int_to_ptr.vmem [resolvable:$true] %s253_s14 }
  0x64   : > { %p3719_p13 = scmp.ne.s32.totalorder %s3711_s6, 0  ;;  %s2881_s18 = scalar_lea.hbm %s3695_s3, 4096 }
  0x65   : > { %p2882_p3 = scmp.lt.u32.totalorder %s3185_s28, %s3695_s3  ;;  %p2883_p6 = scmp.lt.u32.totalorder %s2881_s18, %s2876_s29 }
  0x66   : > { %p3720_p2 = pneg %p3719_p13  ;;  %p2885_p8 = scmp.lt.u32.totalorder %s2876_s29, %s3185_s28 }
  0x67   : > { %p2884_p11 = por %p2883_p6, %p2882_p3 }
  0x68   : > { %p2879_p9 = pnand %p2877_p12, %p3720_p2 }
  0x69   : > { %p2886_p1 = por %p2885_p8, %p2884_p11 }
  0x6a   : > { %p2880_p10 = pneg %p2879_p9 }
  0x6c   : > { %p2887_p4 = pnand %p2886_p1, %p2880_p10 }
  0x6e   : > { %2890 = shalt.err (!%p2887_p4)
}
  0x6f   : > { %s2891_s8 = scalar_lea.vmem %s3211_s14, 2048  ;;  %p3721_p7 = pmov %p3720_p2 }
  0x70   : > { %p2892_p5 = scmp.ne.s32.totalorder %s3211_s14, %s2891_s8  ;;  %s3001_s12 = smov [#allocation11]  }
  0x71   : > { %s2896_s13 = sshll.u32 %s3001_s12, 4  ;;  %s2897_s13 = int_to_ptr.vmem [resolvable:$false] %s2896_s13 }
  0x72   : > { %p2894_p0 = pnand %p2892_p5, %p3721_p7  ;;  %s2898_s7 = scalar_lea.vmem %s2897_s13, 4096 }
  0x73   : > { %p2899_p2 = scmp.lt.s32.totalorder %s3211_s14, %s2897_s13  ;;  %p2900_p9 = scmp.lt.s32.totalorder %s2898_s7, %s2891_s8 }
  0x74   : > { %p2895_p12 = pneg %p2894_p0 }
  0x75   : > { %p2901_p3 = por %p2900_p9, %p2899_p2 }
  0x77   : > { %p2902_p6 = pnand %p2901_p3, %p2895_p12 }
  0x79   : > { %2905 = shalt.err (!%p2902_p6)
}
  0x7a   : > { %2686 = dma.hbm_to_vmem [thread:$0]  (!%p3719_p13), %s3185_s28, 2048, %s3211_s14, %s3149_s15, %s2998_s16, %s2998_s16, %s2999_s10  }
  0x7b   : > { %p3722_p10 = scmp.ne.s32.totalorder %s3709_s27, 0 }
  0x7c   : > { %p3723_p11 = scmp.eq.s32.totalorder (!%p3722_p10), %s3069_s24, 0 }
  0x7d   : > { %271 = sbr.rel (%p3722_p10) target bundleno = 1634 (0x662), region = 40 }
  0x84   : > { %2957 = dma.done.wait (%p3723_p11), [#allocation6], 64   ;;  %p3724_p8 = pmov %p3723_p11 }
  0x86   : > { %2959 = vsyncadd (%p3724_p8), [#allocation6], 4294967232  ;;  %p3725_p1 = pmov %p3724_p8 }
  0x88   : > { %2961 = dma.done.wait (%p3725_p1), [#allocation9], 1024   ;;  %p3726_p4 = pmov %p3725_p1 }
  0x89   : > { %s281_s6 = sand.u32 1, %s3069_s24   ;;  %s283_s15 = sand.u32 1, %s2978_s19  }
  0x8a   : > { %2963 = vsyncadd (%p3726_p4), [#allocation9], 4294966272  ;;  %s1938_s16 = sshll.u32 %s283_s15, 7  ;;  %s282_s27 = scalar_lea.sflag [#allocation6], %s281_s6 }
  0x8b   : > { %s3252_s10 = scalar_lea.vmem [#allocation10], %s1938_s16  ;;  %p3727_p13 = scmp.ne.s32.totalorder %s3708_s26, 0 }
  0x8d   : > { %2965 = dma.done.wait (%p3727_p13), %s282_s27, 4096  }
  0x8e   : > { %2967 = vsyncadd (%p3727_p13), %s282_s27, 4294963200  ;;  %p325_p5 = scmp.lt.s32.totalorder %s2986_s21, 1  ;;  %p328_p7 = scmp.eq.s32.totalorder %s2986_s21, 0 }
  0x8f   : > { %s3266_s14 = scalar_lea.vmem [#allocation11], %s1938_s16  ;;  %v334_v0 = vld [vmem:[#allocation8] sm:$0xff] (%p328_p7)  ;;  %v335_v1 = vld [vmem:[#allocation8 + $0x8] sm:$0xff] (%p328_p7)  ;;  %v336_v2 = vld [vmem:[#allocation8 + $0x10] sm:$0xff] (%p328_p7)  ;;  %vm350_vm0 = vcmask (%p328_p7), 7168   ;;  %v3002_v6 = vmov (%p328_p7), 0.0  }
  0x90   : > { %s326_s28 = scalar_select %p325_p5, %s2986_s21, 1 }
  0x91   : > { %333 = sbr.rel (!%p328_p7) target bundleno = 153 (0x99), region = 60  ;;  %342 = vst [vmem:[#allocation2] sm:$0xff] (%p328_p7), %v334_v0  ;;  %343 = vst [vmem:[#allocation2 + $0x8] sm:$0xff] (%p328_p7), %v335_v1  ;;  %v337_v3 = vld [vmem:[#allocation8 + $0x18] sm:$0xff] (%p328_p7)  ;;  %v338_v4 = vld [vmem:[#allocation8 + $0x20] sm:$0xff] (%p328_p7) }
  0x92   : > { %s3264_s17 = scalar_lea.vmem %s3696_s4, %s326_s28  ;;  %344 = vst [vmem:[#allocation2 + $0x10] sm:$0xff] (%p328_p7), %v336_v2  ;;  %v339_v5 = vld [vmem:[#allocation8 + $0x28] sm:$0xff] (%p328_p7)  ;;  %351 = vst.msk [vmem:[#allocation4] sm:$0xff] (%p328_p7), %vm350_vm0, %v3002_v6  ;;  %v340_v7 = vld [vmem:[#allocation8 + $0x30] sm:$0xff] (%p328_p7) }
  0x93   : > { %352 = vst.msk [vmem:[#allocation4 + $0x8] sm:$0xff] (%p328_p7), %vm350_vm0, %v3002_v6  ;;  %353 = vst.msk [vmem:[#allocation4 + $0x10] sm:$0xff] (%p328_p7), %vm350_vm0, %v3002_v6  ;;  %v341_v8 = vld [vmem:[#allocation8 + $0x38] sm:$0xff] (%p328_p7) }
  0x94   : > { %354 = vst.msk [vmem:[#allocation4 + $0x18] sm:$0xff] (%p328_p7), %vm350_vm0, %v3002_v6  ;;  %355 = vst.msk [vmem:[#allocation4 + $0x20] sm:$0xff] (%p328_p7), %vm350_vm0, %v3002_v6 }
  0x95   : > { %356 = vst.msk [vmem:[#allocation4 + $0x28] sm:$0xff] (%p328_p7), %vm350_vm0, %v3002_v6  ;;  %357 = vst.msk [vmem:[#allocation4 + $0x30] sm:$0xff] (%p328_p7), %vm350_vm0, %v3002_v6 }
  0x96   : > { %358 = vst.msk [vmem:[#allocation4 + $0x38] sm:$0xff] (%p328_p7), %vm350_vm0, %v3002_v6  ;;  %345 = vst [vmem:[#allocation2 + $0x18] sm:$0xff] (%p328_p7), %v337_v3 }
  0x97   : > { %346 = vst [vmem:[#allocation2 + $0x20] sm:$0xff] (%p328_p7), %v338_v4  ;;  %347 = vst [vmem:[#allocation2 + $0x28] sm:$0xff] (%p328_p7), %v339_v5 }
  0x98   : > { %348 = vst [vmem:[#allocation2 + $0x30] sm:$0xff] %v340_v7  ;;  %349 = vst [vmem:[#allocation2 + $0x38] sm:$0xff] %v341_v8 }
  0x99 PF: > { %v373_v9 = vlaneseq  ;;  %v494_v10 = vld [vmem:[#allocation2] sm:$0xff]  ;;  %v495_v11 = vld [vmem:[#allocation2 + $0x8] sm:$0xff]  ;;  %v3003_v26 = vmov 0.0   ;;  %p2021_p0 = scmp.ne.s32.totalorder %s2986_s21, 0 }
  0x9a   : > { %v2465_v12 = vpack.c.bf16 %v495_v11, %v494_v10  ;;  %v496_v13 = vld [vmem:[#allocation2 + $0x10] sm:$0xff]  ;;  %v370_v19 = vld [vmem:[#allocation5] ss:$2 sm:$0x3] }
  0x9b   : > { %v3270_v15 = vshrl.u32 %v373_v9, 7 }
  0x9c   : > { %2466 = vmatprep.subr.bf16.mxu0 %v2465_v12 }
  0x9d   : > { %v384_v20 = vsub.s32 0, %v3270_v15  ;;  %v3274_v21 = vadd.s32 8, %v3270_v15  ;;  %2468 = vmatpush3.bf16.msra.mxu0 %v2465_v12  ;;  %v3281_v24 = vadd.s32 16, %v3270_v15  ;;  %v388_v25 = vsub.s32 1, %v3270_v15 }
  0x9e   : > { %v497_v14 = vld [vmem:[#allocation2 + $0x18] sm:$0xff]  ;;  %v3288_v31 = vadd.s32 24, %v3270_v15  ;;  %v3298_v36 = vadd.s32 32, %v3270_v15  ;;  %v3305_v39 = vadd.s32 40, %v3270_v15  ;;  %v3312_v42 = vadd.s32 48, %v3270_v15 }
  0x9f   : > { %v2469_v16 = vpack.c.bf16 %v497_v14, %v496_v13  ;;  %v498_v17 = vld [vmem:[#allocation2 + $0x20] sm:$0xff]  ;;  %v499_v18 = vld [vmem:[#allocation2 + $0x28] sm:$0xff]  ;;  %v385_v23 = vrot.slane %v370_v19, %v384_v20  ;;  %v500_v28 = vld [vmem:[#allocation2 + $0x30] sm:$0xff]  ;;  %v389_v32 = vrot.slane %v370_v19, %v388_v25  ;;  %v3319_v45 = vadd.s32 56, %v3270_v15 }
  0xa0   : > { %v2473_v22 = vpack.c.bf16 %v499_v18, %v498_v17  ;;  %v501_v29 = vld [vmem:[#allocation2 + $0x38] sm:$0xff] }
  0xa1   : > { %2470 = vmatprep.subr.bf16.mxu0 %v2469_v16  ;;  %vm390_vm1 = vcmp.eq.s32.totalorder %v3270_v15, %v385_v23  ;;  %vm392_vm2 = vcmp.eq.s32.totalorder %v3274_v21, %v385_v23  ;;  %vm394_vm3 = vcmp.eq.s32.totalorder %v3281_v24, %v385_v23  ;;  %v2477_v33 = vpack.c.bf16 %v501_v29, %v500_v28 }
  0xa2   : > { %2472 = vmatpush3.bf16.msra.mxu0 %v2469_v16  ;;  %v1941_v27 = vsel %vm390_vm1, 1.0, %v3003_v26  ;;  %v1943_v30 = vsel %vm392_vm2, 1.0, %v3003_v26  ;;  %vm391_vm4 = vcmp.eq.s32.totalorder %v3270_v15, %v389_v32  ;;  %vm393_vm5 = vcmp.eq.s32.totalorder %v3274_v21, %v389_v32 }
  0xa3   : > { %2474 = vmatprep.subr.bf16.mxu0 %v2473_v22  ;;  %502 = vxpose.xlu0.b32.start [1/8] (short) %v1941_v27, 128  ;;  %v1945_v34 = vsel %vm394_vm3, 1.0, %v3003_v26  ;;  %v1942_v35 = vsel %vm391_vm4, 1.0, %v3003_v26  ;;  %vm396_vm6 = vcmp.eq.s32.totalorder %v3288_v31, %v385_v23  ;;  %v1944_v37 = vsel %vm393_vm5, 1.0, %v3003_v26 }
  0xa4   : > { %534 = vxpose.xlu1.b32.start [1/8] (short) %v1942_v35, 128  ;;  %vm395_vm7 = vcmp.eq.s32.totalorder %v3281_v24, %v389_v32  ;;  %v1947_v38 = vsel %vm396_vm6, 1.0, %v3003_v26  ;;  %vm398_vm8 = vcmp.eq.s32.totalorder %v3298_v36, %v385_v23  ;;  %vm397_vm9 = vcmp.eq.s32.totalorder %v3288_v31, %v389_v32 }
  0xa5   : > { %v1946_v40 = vsel %vm395_vm7, 1.0, %v3003_v26  ;;  %v1949_v41 = vsel %vm398_vm8, 1.0, %v3003_v26  ;;  %vm400_vm10 = vcmp.eq.s32.totalorder %v3305_v39, %v385_v23  ;;  %v1948_v43 = vsel %vm397_vm9, 1.0, %v3003_v26 }
  0xa6   : > { %2476 = vmatpush3.bf16.msra.mxu0 %v2473_v22  ;;  %vm399_vm11 = vcmp.eq.s32.totalorder %v3298_v36, %v389_v32  ;;  %v1951_v44 = vsel %vm400_vm10, 1.0, %v3003_v26  ;;  %vm402_vm12 = vcmp.eq.s32.totalorder %v3312_v42, %v385_v23  ;;  %vm401_vm13 = vcmp.eq.s32.totalorder %v3305_v39, %v389_v32 }
  0xa7   : > { %503 = vxpose.xlu0.b32.cont [2/8] (short) %v1943_v30, 128  ;;  %2478 = vmatprep.subr.bf16.mxu0 %v2477_v33  ;;  %v1950_v46 = vsel %vm399_vm11, 1.0, %v3003_v26  ;;  %v1953_v47 = vsel %vm402_vm12, 1.0, %v3003_v26  ;;  %vm404_vm14 = vcmp.eq.s32.totalorder %v3319_v45, %v385_v23  ;;  %v1952_v48 = vsel %vm401_vm13, 1.0, %v3003_v26  ;;  %v372_v23 = vld [vmem:[#allocation5 + $0x1] ss:$2 sm:$0x3] }
  0xa8   : > { %535 = vxpose.xlu1.b32.cont [2/8] (short) %v1944_v37, 128  ;;  %vm403_vm15 = vcmp.eq.s32.totalorder %v3312_v42, %v389_v32  ;;  %v1955_v49 = vsel %vm404_vm14, 1.0, %v3003_v26  ;;  %vm405_vm0 = vcmp.eq.s32.totalorder %v3319_v45, %v389_v32  ;;  %vm566_vm1 = vcmask 523264  }
  0xa9   : > { %v1954_v50 = vsel %vm403_vm15, 1.0, %v3003_v26  ;;  %v1956_v51 = vsel %vm405_vm0, 1.0, %v3003_v26  ;;  %v3365_v27 = vrot.slane %v372_v23, %v388_v25  ;;  %v3369_v28 = vrot.slane %v372_v23, %v384_v20 }
  0xaa   : > { %2480 = vmatpush3.bf16.msra.mxu0 %v2477_v33  ;;  %v3004_v30 = vmov 1.0  }
  0xab   : > { %504 = vxpose.xlu0.b32.cont [3/8] (short) %v1945_v34, 128  ;;  %vm447_vm2 = vcmp.eq.s32.totalorder %v3270_v15, %v3365_v27  ;;  %vm446_vm3 = vcmp.eq.s32.totalorder %v3270_v15, %v3369_v28  ;;  %vm449_vm4 = vcmp.eq.s32.totalorder %v3274_v21, %v3365_v27  ;;  %vm448_vm5 = vcmp.eq.s32.totalorder %v3274_v21, %v3369_v28 }
  0xac   : > { %536 = vxpose.xlu1.b32.cont [3/8] (short) %v1946_v40, 128  ;;  %v3374_v29 = vsel %vm447_vm2, 1.0, %v3003_v26  ;;  %2005 = vmatprep.mubr.msk.f32.mxu1 %vm447_vm2, %v3004_v30  ;;  %v3383_v25 = vsel %vm446_vm3, 1.0, %v3003_v26  ;;  %v3391_v20 = vsel %vm449_vm4, 1.0, %v3003_v26  ;;  %v3399_v32 = vsel %vm448_vm5, 1.0, %v3003_v26 }
  0xad   : > { %vm451_vm6 = vcmp.eq.s32.totalorder %v3281_v24, %v3365_v27  ;;  %vm450_vm7 = vcmp.eq.s32.totalorder %v3281_v24, %v3369_v28  ;;  %vm453_vm8 = vcmp.eq.s32.totalorder %v3288_v31, %v3365_v27  ;;  %vm452_vm9 = vcmp.eq.s32.totalorder %v3288_v31, %v3369_v28 }
  0xae   : > { %v3407_v33 = vsel %vm451_vm6, 1.0, %v3003_v26  ;;  %v3415_v34 = vsel %vm450_vm7, 1.0, %v3003_v26  ;;  %v3423_v35 = vsel %vm453_vm8, 1.0, %v3003_v26  ;;  %v3431_v37 = vsel %vm452_vm9, 1.0, %v3003_v26 }
  0xaf   : > { %505 = vxpose.xlu0.b32.cont [4/8] (short) %v1947_v38, 128  ;;  %vm455_vm10 = vcmp.eq.s32.totalorder %v3298_v36, %v3365_v27  ;;  %vm454_vm11 = vcmp.eq.s32.totalorder %v3298_v36, %v3369_v28  ;;  %vm457_vm12 = vcmp.eq.s32.totalorder %v3305_v39, %v3365_v27  ;;  %vm456_vm13 = vcmp.eq.s32.totalorder %v3305_v39, %v3369_v28 }
  0xb0   : > { %537 = vxpose.xlu1.b32.cont [4/8] (short) %v1948_v43, 128  ;;  %v3439_v38 = vsel %vm455_vm10, 1.0, %v3003_v26  ;;  %v3447_v40 = vsel %vm454_vm11, 1.0, %v3003_v26  ;;  %v3463_v43 = vsel %vm456_vm13, 1.0, %v3003_v26  ;;  %vm459_vm14 = vcmp.eq.s32.totalorder %v3312_v42, %v3365_v27 }
  0xb1   : > { %vm458_vm15 = vcmp.eq.s32.totalorder %v3312_v42, %v3369_v28  ;;  %vm461_vm0 = vcmp.eq.s32.totalorder %v3319_v45, %v3365_v27  ;;  %vm1060_vm2 = vcmask (!%p2021_p0), 7168  }
  0xb3   : > { %506 = vxpose.xlu0.b32.cont [5/8] (short) %v1949_v41, 128  ;;  %v3455_v41 = vsel %vm457_vm12, 1.0, %v3003_v26 }
  0xb4   : > { %538 = vxpose.xlu1.b32.cont [5/8] (short) %v1950_v46, 128  ;;  %v3479_v46 = vsel %vm458_vm15, 1.0, %v3003_v26 }
  0xb7   : > { %507 = vxpose.xlu0.b32.cont [6/8] (short) %v1951_v44, 128  ;;  %v3471_v44 = vsel %vm459_vm14, 1.0, %v3003_v26 }
  0xb8   : > { %539 = vxpose.xlu1.b32.cont [6/8] (short) %v1952_v48, 128 }
  0xbb   : > { %508 = vxpose.xlu0.b32.cont [7/8] (short) %v1953_v47, 128  ;;  %v3487_v47 = vsel %vm461_vm0, 1.0, %v3003_v26 }
  0xbc   : > { %540 = vxpose.xlu1.b32.cont [7/8] (short) %v1954_v50, 128 }
  0xbf   : > { %509 = vxpose.xlu0.b32.end [8/8] (short) %v1955_v49, 128 }
  0xc0   : > { %541 = vxpose.xlu1.b32.end [8/8] (short) %v1956_v51, 128 }
 0x123   : > { %v518_v52 = vpop.trf.xlu0 }
 0x124   : > { %2241 = vmatprep.mubr.msk.f32.mxu0 %vm566_vm1, %v518_v52  ;;  %v550_v54 = vpop.trf.xlu1 }
 0x127   : > { %v519_v53 = vpop.trf.xlu0 }
 0x128   : > { %2242 = vmatmul.mubr.msk.f32.vlgmr.msra.gmra.mrb[0].mxu0 %vm566_vm1, %v519_v53  ;;  %v551_v56 = vpop.trf.xlu1 }
 0x12b   : > { %v520_v55 = vpop.trf.xlu0 }
 0x12c   : > { %2244 = vmatprep.mubr.msk.f32.mxu0 %vm566_vm1, %v520_v55  ;;  %v552_v58 = vpop.trf.xlu1 }
 0x12f   : > { %v521_v57 = vpop.trf.xlu0 }
 0x130   : > { %2245 = vmatmul.mubr.msk.f32.gmra.mrb[2].mxu0 %vm566_vm1, %v521_v57  ;;  %v553_v60 = vpop.trf.xlu1 }
 0x133   : > { %v522_v59 = vpop.trf.xlu0 }
 0x134   : > { %2247 = vmatprep.mubr.msk.f32.mxu0 %vm566_vm1, %v522_v59  ;;  %v554_v63 = vpop.trf.xlu1 }
 0x137   : > { %v523_v61 = vpop.trf.xlu0 }
 0x138   : > { %2248 = vmatmul.mubr.msk.f32.gmra.mrb[4].mxu0 %vm566_vm1, %v523_v61  ;;  %v555_v1 = vpop.trf.xlu1 }
 0x13b   : > { %v524_v62 = vpop.trf.xlu0 }
 0x13c   : > { %2250 = vmatprep.mubr.msk.f32.mxu0 %vm566_vm1, %v524_v62  ;;  %v556_v4 = vpop.trf.xlu1 }
 0x13f   : > { %v525_v0 = vpop.trf.xlu0 }
 0x140   : > { %2251 = vmatmul.mubr.msk.f32.gmra.mrb[6].mxu0 %vm566_vm1, %v525_v0  ;;  %v557_v6 = vpop.trf.xlu1 }
 0x143   : > { %v526_v2 = vpop.trf.xlu0 }
 0x144   : > { %2253 = vmatprep.mubr.msk.f32.mxu0 %vm566_vm1, %v526_v2  ;;  %v558_v9 = vpop.trf.xlu1 }
 0x147   : > { %v527_v3 = vpop.trf.xlu0 }
 0x148   : > { %2254 = vmatmul.mubr.msk.f32.gmra.mrb[8].mxu0 %vm566_vm1, %v527_v3  ;;  %v559_v11 = vpop.trf.xlu1 }
 0x14b   : > { %v528_v5 = vpop.trf.xlu0 }
 0x14c   : > { %2256 = vmatprep.mubr.msk.f32.mxu0 %vm566_vm1, %v528_v5  ;;  %v560_v14 = vpop.trf.xlu1 }
 0x14f   : > { %v529_v7 = vpop.trf.xlu0 }
 0x150   : > { %2257 = vmatmul.mubr.msk.f32.gmra.mrb[10].mxu0 %vm566_vm1, %v529_v7  ;;  %v561_v16 = vpop.trf.xlu1 }
 0x153   : > { %v530_v8 = vpop.trf.xlu0 }
 0x154   : > { %2259 = vmatprep.mubr.msk.f32.mxu0 %vm566_vm1, %v530_v8  ;;  %v562_v17 = vpop.trf.xlu1 }
 0x157   : > { %v531_v10 = vpop.trf.xlu0 }
 0x158   : > { %2260 = vmatmul.mubr.msk.f32.gmra.mrb[12].mxu0 %vm566_vm1, %v531_v10  ;;  %v563_v18 = vpop.trf.xlu1 }
 0x15b   : > { %v532_v12 = vpop.trf.xlu0 }
 0x15c   : > { %2262 = vmatprep.mubr.msk.f32.mxu0 %vm566_vm1, %v532_v12  ;;  %v564_v19 = vpop.trf.xlu1 }
 0x15f   : > { %v533_v13 = vpop.trf.xlu0 }
 0x160   : > { %2263 = vmatmul.mubr.msk.f32.gmra.mrb[14].mxu0 %vm566_vm1, %v533_v13  ;;  %v565_v22 = vpop.trf.xlu1 }
 0x161   : > { %2265 = vmatprep.mubr.msk.f32.mxu0 %vm566_vm1, %v550_v54 }
 0x164   : > { %2266 = vmatmul.mubr.msk.f32.gmra.mrb[16].mxu0 %vm566_vm1, %v551_v56 }
 0x165   : > { %2268 = vmatprep.mubr.msk.f32.mxu0 %vm566_vm1, %v552_v58 }
 0x168   : > { %2269 = vmatmul.mubr.msk.f32.gmra.mrb[18].mxu0 %vm566_vm1, %v553_v60 }
 0x169   : > { %2271 = vmatprep.mubr.msk.f32.mxu0 %vm566_vm1, %v554_v63 }
 0x16c   : > { %2272 = vmatmul.mubr.msk.f32.gmra.mrb[20].mxu0 %vm566_vm1, %v555_v1 }
 0x16d   : > { %2274 = vmatprep.mubr.msk.f32.mxu0 %vm566_vm1, %v556_v4 }
 0x170   : > { %2275 = vmatmul.mubr.msk.f32.gmra.mrb[22].mxu0 %vm566_vm1, %v557_v6 }
 0x171   : > { %2277 = vmatprep.mubr.msk.f32.mxu0 %vm566_vm1, %v558_v9 }
 0x174   : > { %2278 = vmatmul.mubr.msk.f32.gmra.mrb[24].mxu0 %vm566_vm1, %v559_v11 }
 0x175   : > { %2280 = vmatprep.mubr.msk.f32.mxu0 %vm566_vm1, %v560_v14 }
 0x178   : > { %2281 = vmatmul.mubr.msk.f32.gmra.mrb[26].mxu0 %vm566_vm1, %v561_v16 }
 0x179   : > { %2283 = vmatprep.mubr.msk.f32.mxu0 %vm566_vm1, %v562_v17 }
 0x17c   : > { %2284 = vmatmul.mubr.msk.f32.gmra.mrb[28].mxu0 %vm566_vm1, %v563_v18 }
 0x17d   : > { %2286 = vmatprep.mubr.msk.f32.mxu0 %vm566_vm1, %v564_v19 }
 0x180   : > { %2287 = vmatmul.mubr.msk.f32.gmra.mrb[30].mxu0 %vm566_vm1, %v565_v22  ;;  %vm460_vm1 = vcmp.eq.s32.totalorder %v3319_v45, %v3369_v28 }
 0x181   : > { %v3495_v48 = vsel %vm460_vm1, 1.0, %v3003_v26 }
 0x1fb   : > { %v2243_v49 = vpop.f32.mrb[0].mxu0 }
 0x1fc   : > { %v729_v50 = vpop.f32.mrb[1].mxu0 }
 0x1fd   : > { %v2483_v51 = vpack.c.bf16 %v2243_v49, %v729_v50 }
 0x203   : > { %v2246_v52 = vpop.f32.mrb[2].mxu0 }
 0x204   : > { %v739_v53 = vpop.f32.mrb[3].mxu0 }
 0x205   : > { %v2487_v54 = vpack.c.bf16 %v2246_v52, %v739_v53 }
 0x20b   : > { %v2249_v55 = vpop.f32.mrb[4].mxu0 }
 0x20c   : > { %v749_v56 = vpop.f32.mrb[5].mxu0 }
 0x20d   : > { %v2491_v57 = vpack.c.bf16 %v2249_v55, %v749_v56 }
 0x213   : > { %v2252_v58 = vpop.f32.mrb[6].mxu0 }
 0x214   : > { %v759_v59 = vpop.f32.mrb[7].mxu0 }
 0x215   : > { %v2495_v60 = vpack.c.bf16 %v2252_v58, %v759_v59 }
 0x21b   : > { %v2255_v61 = vpop.f32.mrb[8].mxu0 }
 0x21c   : > { %v769_v62 = vpop.f32.mrb[9].mxu0 }
 0x21d   : > { %v2499_v63 = vpack.c.bf16 %v2255_v61, %v769_v62 }
 0x223   : > { %v2258_v0 = vpop.f32.mrb[10].mxu0 }
 0x224   : > { %v779_v1 = vpop.f32.mrb[11].mxu0 }
 0x225   : > { %v2503_v2 = vpack.c.bf16 %v2258_v0, %v779_v1 }
 0x22b   : > { %v2261_v26 = vpop.f32.mrb[12].mxu0 }
 0x22c   : > { %v789_v3 = vpop.f32.mrb[13].mxu0 }
 0x22d   : > { %v2507_v4 = vpack.c.bf16 %v2261_v26, %v789_v3 }
 0x233   : > { %v2264_v5 = vpop.f32.mrb[14].mxu0 }
 0x234   : > { %v799_v6 = vpop.f32.mrb[15].mxu0 }
 0x235   : > { %v2511_v7 = vpack.c.bf16 %v2264_v5, %v799_v6 }
 0x237   : > { %v2267_v8 = vpop.f32.mrb[16].mxu0 }
 0x238   : > { %v809_v9 = vpop.f32.mrb[17].mxu0 }
 0x239   : > { %v2481_v10 = vpack.c.bf16 %v2267_v8, %v809_v9  ;;  %v1034_v8 = vadd.f32 (!%p2021_p0), %v3407_v33, %v3415_v34  ;;  %v1028_v9 = vadd.f32 (!%p2021_p0), %v3374_v29, %v3383_v25  ;;  %v1049_v29 = vadd.f32 (!%p2021_p0), %v3487_v47, %v3495_v48  ;;  %v1022_v33 = vld [vmem:[#allocation4 + $0x10] sm:$0xff] (!%p2021_p0) }
 0x23a   : > { %v1046_v25 = vadd.f32 (!%p2021_p0), %v3471_v44, %v3479_v46  ;;  %v1025_v44 = vld [vmem:[#allocation4 + $0x28] sm:$0xff] (!%p2021_p0)  ;;  %v1024_v46 = vld [vmem:[#allocation4 + $0x20] sm:$0xff] (!%p2021_p0) }
 0x23b   : > { %v2270_v11 = vpop.f32.mrb[18].mxu0  ;;  %2482 = vmatprep.subr.bf16.mxu1 %v2481_v10  ;;  %1035 = vadd.xlane.f32.xlu1 (!%p2021_p0), %v1034_v8  ;;  %v1037_v10 = vadd.f32 (!%p2021_p0), %v3423_v35, %v3431_v37 }
 0x23c   : > { %v819_v12 = vpop.f32.mrb[19].mxu0  ;;  %2484 = vmatpush3.bf16.msra.mxu1 %v2483_v51  ;;  %1029 = vadd.xlane.f32.xlu0 (!%p2021_p0), %v1028_v9 }
 0x23d   : > { %v2485_v13 = vpack.c.bf16 %v2270_v11, %v819_v12  ;;  %v1031_v11 = vadd.f32 (!%p2021_p0), %v3391_v20, %v3399_v32  ;;  %v1043_v12 = vadd.f32 (!%p2021_p0), %v3455_v41, %v3463_v43  ;;  %v1020_v20 = vld [vmem:[#allocation4] sm:$0xff] (!%p2021_p0)  ;;  %v1023_v41 = vld [vmem:[#allocation4 + $0x18] sm:$0xff] (!%p2021_p0)  ;;  %v1021_v43 = vld [vmem:[#allocation4 + $0x8] sm:$0xff] (!%p2021_p0) }
 0x23f   : > { %v2273_v14 = vpop.f32.mrb[20].mxu0  ;;  %2486 = vmatprep.subr.bf16.mxu1 %v2485_v13  ;;  %1038 = vadd.xlane.f32.xlu1 (!%p2021_p0), %v1037_v10  ;;  %v1040_v13 = vadd.f32 (!%p2021_p0), %v3439_v38, %v3447_v40 }
 0x240   : > { %v829_v16 = vpop.f32.mrb[21].mxu0  ;;  %2488 = vmatpush3.bf16.msra.mxu1 %v2487_v54  ;;  %1032 = vadd.xlane.f32.xlu0 (!%p2021_p0), %v1031_v11 }
 0x241   : > { %v2489_v17 = vpack.c.bf16 %v2273_v14, %v829_v16 }
 0x243   : > { %v2276_v18 = vpop.f32.mrb[22].mxu0  ;;  %2490 = vmatprep.subr.bf16.mxu1 %v2489_v17  ;;  %1044 = vadd.xlane.f32.xlu1 (!%p2021_p0), %v1043_v12 }
 0x244   : > { %v839_v19 = vpop.f32.mrb[23].mxu0  ;;  %2492 = vmatpush3.bf16.msra.mxu1 %v2491_v57  ;;  %1041 = vadd.xlane.f32.xlu0 (!%p2021_p0), %v1040_v13 }
 0x245   : > { %v2493_v22 = vpack.c.bf16 %v2276_v18, %v839_v19  ;;  %v1027_v19 = vld [vmem:[#allocation4 + $0x38] sm:$0xff] (!%p2021_p0) }
 0x247   : > { %v2279_v23 = vpop.f32.mrb[24].mxu0  ;;  %2494 = vmatprep.subr.bf16.mxu1 %v2493_v22  ;;  %1050 = vadd.xlane.f32.xlu1 (!%p2021_p0), %v1049_v29  ;;  %v1026_v22 = vld [vmem:[#allocation4 + $0x30] sm:$0xff] (!%p2021_p0) }
 0x248   : > { %v849_v49 = vpop.f32.mrb[25].mxu0  ;;  %2496 = vmatpush3.bf16.msra.mxu1 %v2495_v60  ;;  %1047 = vadd.xlane.f32.xlu0 (!%p2021_p0), %v1046_v25 }
 0x249   : > { %v2497_v50 = vpack.c.bf16 %v2279_v23, %v849_v49 }
 0x24b   : > { %v2282_v52 = vpop.f32.mrb[26].mxu0  ;;  %2498 = vmatprep.subr.bf16.mxu1 %v2497_v50 }
 0x24c   : > { %v859_v53 = vpop.f32.mrb[27].mxu0  ;;  %2500 = vmatpush3.bf16.msra.mxu1 %v2499_v63 }
 0x24d   : > { %v2501_v51 = vpack.c.bf16 %v2282_v52, %v859_v53 }
 0x24f   : > { %v2285_v55 = vpop.f32.mrb[28].mxu0  ;;  %2502 = vmatprep.subr.bf16.mxu1 %v2501_v51 }
 0x250   : > { %v869_v56 = vpop.f32.mrb[29].mxu0  ;;  %2504 = vmatpush3.bf16.msra.mxu1 %v2503_v2 }
 0x251   : > { %v2505_v54 = vpack.c.bf16 %v2285_v55, %v869_v56 }
 0x253   : > { %v2288_v58 = vpop.f32.mrb[30].mxu0  ;;  %2506 = vmatprep.subr.bf16.mxu1 %v2505_v54 }
 0x254   : > { %v879_v59 = vpop.f32.mrb[31].mxu0  ;;  %2508 = vmatpush3.bf16.msra.mxu1 %v2507_v4 }
 0x255   : > { %v2509_v57 = vpack.c.bf16 %v2288_v58, %v879_v59 }
 0x257   : > { %2510 = vmatprep.subr.bf16.mxu1 %v2509_v57 }
 0x258   : > { %2512 = vmatpush3.bf16.msra.mxu1 %v2511_v7 }
 0x25b   : > { %2006 = vmatmul.mubr.msk.f32.vlgmr.msra.gmra.mrb[0].mxu1 %vm446_vm3, %v3004_v30 }
 0x25c   : > { %2007 = vmatprep.mubr.msk.f32.mxu1 %vm449_vm4, %v3004_v30 }
 0x25f   : > { %2008 = vmatmul.mubr.msk.f32.gmra.mrb[2].mxu1 %vm448_vm5, %v3004_v30 }
 0x260   : > { %2009 = vmatprep.mubr.msk.f32.mxu1 %vm451_vm6, %v3004_v30 }
 0x263   : > { %2010 = vmatmul.mubr.msk.f32.gmra.mrb[4].mxu1 %vm450_vm7, %v3004_v30 }
 0x264   : > { %2011 = vmatprep.mubr.msk.f32.mxu1 %vm453_vm8, %v3004_v30 }
 0x267   : > { %2012 = vmatmul.mubr.msk.f32.gmra.mrb[6].mxu1 %vm452_vm9, %v3004_v30 }
 0x268   : > { %2013 = vmatprep.mubr.msk.f32.mxu1 %vm455_vm10, %v3004_v30 }
 0x26b   : > { %2014 = vmatmul.mubr.msk.f32.gmra.mrb[8].mxu1 %vm454_vm11, %v3004_v30 }
 0x26c   : > { %2015 = vmatprep.mubr.msk.f32.mxu1 %vm457_vm12, %v3004_v30 }
 0x26f   : > { %2016 = vmatmul.mubr.msk.f32.gmra.mrb[10].mxu1 %vm456_vm13, %v3004_v30 }
 0x270   : > { %2017 = vmatprep.mubr.msk.f32.mxu1 %vm459_vm14, %v3004_v30 }
 0x273   : > { %2018 = vmatmul.mubr.msk.f32.gmra.mrb[12].mxu1 %vm458_vm15, %v3004_v30 }
 0x274   : > { %2019 = vmatprep.mubr.msk.f32.mxu1 %vm461_vm0, %v3004_v30 }
 0x277   : > { %2020 = vmatmul.mubr.msk.f32.gmra.mrb[14].mxu1 %vm460_vm1, %v3004_v30 }
 0x2c8   : > { %v1036_v32 = vpop.xlane.xlu1 (!%p2021_p0), %1035 }
 0x2c9   : > { %v1030_v34 = vpop.xlane.xlu0 (!%p2021_p0), %1029  ;;  %v1054_v35 = vadd.f32 (!%p2021_p0), %v1036_v32, %v1022_v33 }
 0x2ca   : > { %v1052_v37 = vadd.f32 (!%p2021_p0), %v1030_v34, %v1020_v20 }
 0x2cb   : > { %1063 = vst.msk [vmem:[#allocation4 + $0x10] sm:$0xff] (!%p2021_p0), %vm1060_vm2, %v1054_v35 }
 0x2cc   : > { %1061 = vst.msk [vmem:[#allocation4] sm:$0xff] (!%p2021_p0), %vm1060_vm2, %v1052_v37  ;;  %v1039_v38 = vpop.xlane.xlu1 (!%p2021_p0), %1038 }
 0x2cd   : > { %v1033_v40 = vpop.xlane.xlu0 (!%p2021_p0), %1032  ;;  %v1055_v47 = vadd.f32 (!%p2021_p0), %v1039_v38, %v1023_v41 }
 0x2ce   : > { %v1053_v48 = vadd.f32 (!%p2021_p0), %v1033_v40, %v1021_v43 }
 0x2cf   : > { %1064 = vst.msk [vmem:[#allocation4 + $0x18] sm:$0xff] (!%p2021_p0), %vm1060_vm2, %v1055_v47 }
 0x2d0   : > { %1062 = vst.msk [vmem:[#allocation4 + $0x8] sm:$0xff] (!%p2021_p0), %vm1060_vm2, %v1053_v48  ;;  %v1045_v14 = vpop.xlane.xlu1 (!%p2021_p0), %1044 }
 0x2d1   : > { %v1042_v16 = vpop.xlane.xlu0 (!%p2021_p0), %1041  ;;  %v1057_v17 = vadd.f32 (!%p2021_p0), %v1045_v14, %v1025_v44 }
 0x2d2   : > { %v1056_v18 = vadd.f32 (!%p2021_p0), %v1042_v16, %v1024_v46 }
 0x2d3   : > { %1066 = vst.msk [vmem:[#allocation4 + $0x28] sm:$0xff] (!%p2021_p0), %vm1060_vm2, %v1057_v17 }
 0x2d4   : > { %1065 = vst.msk [vmem:[#allocation4 + $0x20] sm:$0xff] (!%p2021_p0), %vm1060_vm2, %v1056_v18  ;;  %v1051_v23 = vpop.xlane.xlu1 (!%p2021_p0), %1050 }
 0x2d5   : > { %v1048_v49 = vpop.xlane.xlu0 (!%p2021_p0), %1047  ;;  %v1059_v50 = vadd.f32 (!%p2021_p0), %v1051_v23, %v1027_v19 }
 0x2d6   : > { %v1058_v52 = vadd.f32 (!%p2021_p0), %v1048_v49, %v1026_v22 }
 0x2d7   : > { %1068 = vst.msk [vmem:[#allocation4 + $0x38] sm:$0xff] (!%p2021_p0), %vm1060_vm2, %v1059_v50 }
 0x2d8   : > { %1067 = vst.msk [vmem:[#allocation4 + $0x30] sm:$0xff] (!%p2021_p0), %vm1060_vm2, %v1058_v52 }
 0x32e   : > { %v2105_v15 = vpop.f32.mrb[0].mxu1 }
 0x32f   : > { %v2106_v21 = vpop.f32.mrb[1].mxu1 }
 0x330   : > { %v2107_v24 = vadd.f32 %v2106_v21, %v2105_v15 }
 0x332   : > { %v2108_v31 = vpop.f32.mrb[2].mxu1  ;;  %1009 = vst [vmem:[#allocation3] sm:$0xff] %v2107_v24 }
 0x333   : > { %v2109_v36 = vpop.f32.mrb[3].mxu1 }
 0x334   : > { %v2110_v39 = vadd.f32 %v2109_v36, %v2108_v31 }
 0x336   : > { %v2111_v60 = vpop.f32.mrb[4].mxu1  ;;  %1010 = vst [vmem:[#allocation3 + $0x8] sm:$0xff] %v2110_v39 }
 0x337   : > { %v2112_v42 = vpop.f32.mrb[5].mxu1 }
 0x338   : > { %v2113_v61 = vadd.f32 %v2112_v42, %v2111_v60 }
 0x33a   : > { %v2114_v62 = vpop.f32.mrb[6].mxu1  ;;  %1011 = vst [vmem:[#allocation3 + $0x10] sm:$0xff] %v2113_v61 }
 0x33b   : > { %v2115_v63 = vpop.f32.mrb[7].mxu1 }
 0x33c   : > { %v2116_v27 = vadd.f32 %v2115_v63, %v2114_v62 }
 0x33e   : > { %v2117_v0 = vpop.f32.mrb[8].mxu1  ;;  %1012 = vst [vmem:[#allocation3 + $0x18] sm:$0xff] %v2116_v27 }
 0x33f   : > { %v2118_v1 = vpop.f32.mrb[9].mxu1 }
 0x340   : > { %v2119_v45 = vadd.f32 %v2118_v1, %v2117_v0 }
 0x342   : > { %v2120_v28 = vpop.f32.mrb[10].mxu1  ;;  %1013 = vst [vmem:[#allocation3 + $0x20] sm:$0xff] %v2119_v45 }
 0x343   : > { %v2121_v30 = vpop.f32.mrb[11].mxu1 }
 0x344   : > { %v2122_v2 = vadd.f32 %v2121_v30, %v2120_v28 }
 0x346   : > { %v2123_v26 = vpop.f32.mrb[12].mxu1  ;;  %1014 = vst [vmem:[#allocation3 + $0x28] sm:$0xff] %v2122_v2 }
 0x347   : > { %v2124_v3 = vpop.f32.mrb[13].mxu1 }
 0x348   : > { %v2125_v4 = vadd.f32 %v2124_v3, %v2123_v26  ;;  %1019 = sbr.rel (%p2021_p0) target bundleno = 847 (0x34f), region = 68 }
 0x34a   : > { %v2126_v5 = vpop.f32.mrb[14].mxu1  ;;  %1015 = vst [vmem:[#allocation3 + $0x30] sm:$0xff] %v2125_v4 }
 0x34b   : > { %v2127_v6 = vpop.f32.mrb[15].mxu1 }
 0x34c   : > { %v2128_v7 = vadd.f32 %v2127_v6, %v2126_v5 }
 0x34e   : > { %1016 = vst [vmem:[#allocation3 + $0x38] sm:$0xff] %v2128_v7 }
 0x34f PF: > { %1070 = sbr.rel (!%p328_p7) target bundleno = 1228 (0x4cc), region = 72  ;;  %v1073_v53 = vld [vmem:[#allocation4 + $0x10] sm:$0xff] (%p328_p7)  ;;  %v1071_v51 = vld [vmem:[#allocation4] sm:$0xff] (%p328_p7)  ;;  %v1074_v55 = vld [vmem:[#allocation4 + $0x18] sm:$0xff] (%p328_p7)  ;;  %v3005_v56 = vmov (%p328_p7), 0  }
 0x350   : > { %2755 = vset.pattern.permute.xlu1 (%p328_p7), %v3005_v56  ;;  %2754 = vset.pattern.permute.xlu0 (%p328_p7), %v3005_v56  ;;  %v1081_v54 = vmax.f32 (%p328_p7), %v1073_v53, 1.0  ;;  %v1079_v58 = vmax.f32 (%p328_p7), %v1071_v51, 1.0  ;;  %v1082_v59 = vmax.f32 (%p328_p7), %v1074_v55, 1.0  ;;  %v1072_v57 = vld [vmem:[#allocation4 + $0x8] sm:$0xff] (%p328_p7)  ;;  %v1075_v24 = vld [vmem:[#allocation4 + $0x20] sm:$0xff] (%p328_p7)  ;;  %v1185_v62 = vld [vmem:[%s3266_s14 + $0x10] sm:$0xff] (%p328_p7) }
 0x351   : > { %v1080_v15 = vmax.f32 (%p328_p7), %v1072_v57, 1.0  ;;  %v1076_v21 = vld [vmem:[#allocation4 + $0x28] sm:$0xff] (%p328_p7)  ;;  %v1186_v63 = vld [vmem:[%s3266_s14 + $0x18] sm:$0xff] (%p328_p7)  ;;  %v1161_v27 = vld [vmem:[%s3252_s10 + $0x10] sm:$0xff] (%p328_p7)  ;;  %v1083_v2 = vmax.f32 (%p328_p7), %v1075_v24, 1.0 }
 0x352   : > { %v1183_v31 = vld [vmem:[%s3266_s14] sm:$0xff] (%p328_p7)  ;;  %2756 = vrcp.f32 (%p328_p7), %v1081_v54  ;;  %v1184_v36 = vld [vmem:[%s3266_s14 + $0x8] sm:$0xff] (%p328_p7)  ;;  %v1084_v0 = vmax.f32 (%p328_p7), %v1076_v21, 1.0  ;;  %v2517_v1 = vpack.c.bf16 (%p328_p7), %v1186_v63, %v1185_v62  ;;  %v1162_v45 = vld [vmem:[%s3252_s10 + $0x18] sm:$0xff] (%p328_p7) }
 0x353   : > { %v1159_v39 = vld [vmem:[%s3252_s10] sm:$0xff] (%p328_p7)  ;;  %v1160_v60 = vld [vmem:[%s3252_s10 + $0x8] sm:$0xff] (%p328_p7)  ;;  %2758 = vrcp.f32 (%p328_p7), %v1079_v58  ;;  %v2513_v42 = vpack.c.bf16 (%p328_p7), %v1184_v36, %v1183_v31  ;;  %v1078_v26 = vld [vmem:[#allocation4 + $0x38] sm:$0xff] (%p328_p7)  ;;  %v2549_v3 = vpack.c.bf16 (%p328_p7), %v1162_v45, %v1161_v27 }
 0x354   : > { %v2545_v61 = vpack.c.bf16 (%p328_p7), %v1160_v60, %v1159_v39  ;;  %2760 = vrcp.f32 (%p328_p7), %v1082_v59  ;;  %v1187_v28 = vld [vmem:[%s3266_s14 + $0x20] sm:$0xff] (%p328_p7)  ;;  %v1188_v30 = vld [vmem:[%s3266_s14 + $0x28] sm:$0xff] (%p328_p7)  ;;  %v1086_v9 = vmax.f32 (%p328_p7), %v1078_v26, 1.0  ;;  %v1189_v10 = vld [vmem:[%s3266_s14 + $0x30] sm:$0xff] (%p328_p7) }
 0x355   : > { %2762 = vrcp.f32 (%p328_p7), %v1080_v15  ;;  %2514 = vmatprep.subr.bf16.mxu1 (%p328_p7), %v2513_v42  ;;  %v1163_v4 = vld [vmem:[%s3252_s10 + $0x20] sm:$0xff] (%p328_p7)  ;;  %v1164_v5 = vld [vmem:[%s3252_s10 + $0x28] sm:$0xff] (%p328_p7)  ;;  %v2521_v7 = vpack.c.bf16 (%p328_p7), %v1188_v30, %v1187_v28  ;;  %v1190_v11 = vld [vmem:[%s3266_s14 + $0x38] sm:$0xff] (%p328_p7) }
 0x356   : > { %2546 = vmatprep.subr.bf16.mxu0 %v2545_v61  ;;  %v1077_v6 = vld [vmem:[#allocation4 + $0x30] sm:$0xff]  ;;  %2516 = vmatpush3.bf16.msra.mxu1 %v2513_v42  ;;  %v2553_v8 = vpack.c.bf16 %v1164_v5, %v1163_v4  ;;  %2764 = vrcp.f32 %v1084_v0  ;;  %v1166_v29 = vld [vmem:[%s3252_s10 + $0x38] sm:$0xff]  ;;  %v2525_v25 = vpack.c.bf16 %v1190_v11, %v1189_v10  ;;  %v1191_v32 = vld [vmem:[%s3266_s14 + $0x40] sm:$0xff] }
 0x357   : > { %2548 = vmatpush3.bf16.msra.mxu0 %v2545_v61  ;;  %2518 = vmatprep.subr.bf16.mxu1 %v2517_v1  ;;  %2766 = vrcp.f32 %v1083_v2  ;;  %v1085_v12 = vmax.f32 %v1077_v6, 1.0  ;;  %v1165_v13 = vld [vmem:[%s3252_s10 + $0x30] sm:$0xff]  ;;  %v1192_v34 = vld [vmem:[%s3266_s14 + $0x48] sm:$0xff]  ;;  %v1167_v37 = vld [vmem:[%s3252_s10 + $0x40] sm:$0xff] }
 0x358   : > { %2550 = vmatprep.subr.bf16.mxu0 %v2549_v3  ;;  %2768 = vrcp.f32 %v1086_v9  ;;  %v2557_v20 = vpack.c.bf16 %v1166_v29, %v1165_v13  ;;  %v1168_v41 = vld [vmem:[%s3252_s10 + $0x48] sm:$0xff]  ;;  %v2529_v40 = vpack.c.bf16 %v1192_v34, %v1191_v32  ;;  %v1193_v48 = vld [vmem:[%s3266_s14 + $0x50] sm:$0xff]  ;;  %v1194_v44 = vld [vmem:[%s3266_s14 + $0x58] sm:$0xff] }
 0x359   : > { %2770 = vrcp.f32 %v1085_v12  ;;  %v2561_v47 = vpack.c.bf16 %v1168_v41, %v1167_v37  ;;  %v1169_v46 = vld [vmem:[%s3252_s10 + $0x50] sm:$0xff]  ;;  %v1170_v14 = vld [vmem:[%s3252_s10 + $0x58] sm:$0xff]  ;;  %v2533_v19 = vpack.c.bf16 %v1194_v44, %v1193_v48  ;;  %v1195_v23 = vld [vmem:[%s3266_s14 + $0x60] sm:$0xff] }
 0x35a   : > { %2520 = vmatpush3.bf16.msra.mxu1 %v2517_v1  ;;  %v1175_v16 = vld [vmem:[#allocation2] sm:$0xff]  ;;  %v2565_v22 = vpack.c.bf16 %v1170_v14, %v1169_v46  ;;  %v1196_v49 = vld [vmem:[%s3266_s14 + $0x68] sm:$0xff]  ;;  %v1197_v54 = vld [vmem:[%s3266_s14 + $0x70] sm:$0xff] }
 0x35b   : > { %2552 = vmatpush3.bf16.msra.mxu0 %v2549_v3  ;;  %2522 = vmatprep.subr.bf16.mxu1 %v2521_v7  ;;  %v1171_v50 = vld [vmem:[%s3252_s10 + $0x60] sm:$0xff]  ;;  %v1172_v52 = vld [vmem:[%s3252_s10 + $0x68] sm:$0xff]  ;;  %v2537_v55 = vpack.c.bf16 %v1196_v49, %v1195_v23  ;;  %v1198_v58 = vld [vmem:[%s3266_s14 + $0x78] sm:$0xff] }
 0x35c   : > { %2554 = vmatprep.subr.bf16.mxu0 %v2553_v8  ;;  %v2757_v33 = vpop.eup %2756  ;;  %2321 = vmatprep.mubr.f32.mxu1 %v1175_v16  ;;  %v2569_v56 = vpack.c.bf16 %v1172_v52, %v1171_v50  ;;  %v1173_v59 = vld [vmem:[%s3252_s10 + $0x70] sm:$0xff]  ;;  %v1174_v57 = vld [vmem:[%s3252_s10 + $0x78] sm:$0xff]  ;;  %v2541_v15 = vpack.c.bf16 %v1198_v58, %v1197_v54  ;;  %v1176_v24 = vld [vmem:[#allocation2 + $0x8] sm:$0xff] }
 0x35d   : > { %v2759_v35 = vpop.eup %2758  ;;  %1123 = vperm.xlu1 %2755, %v2757_v33   ;;  %v2573_v21 = vpack.c.bf16 %v1174_v57, %v1173_v59  ;;  %v1177_v31 = vld [vmem:[#allocation2 + $0x10] sm:$0xff]  ;;  %v1178_v36 = vld [vmem:[#allocation2 + $0x18] sm:$0xff]  ;;  %v1179_v39 = vld [vmem:[#allocation2 + $0x20] sm:$0xff] }
 0x35e   : > { %v2761_v43 = vpop.eup %2760  ;;  %1113 = vperm.xlu0 %2754, %v2759_v35   ;;  %2524 = vmatpush3.bf16.msra.mxu1 %v2521_v7  ;;  %v1180_v60 = vld [vmem:[#allocation2 + $0x28] sm:$0xff]  ;;  %v1181_v42 = vld [vmem:[#allocation2 + $0x30] sm:$0xff]  ;;  %v1182_v61 = vld [vmem:[#allocation2 + $0x38] sm:$0xff] }
 0x35f   : > { %v2763_v38 = vpop.eup %2762  ;;  %2556 = vmatpush3.bf16.msra.mxu0 %v2553_v8  ;;  %2526 = vmatprep.subr.bf16.mxu1 %v2525_v25  ;;  %v1103_v62 = vld [vmem:[#allocation3] sm:$0xff]  ;;  %v1105_v0 = vld [vmem:[#allocation3 + $0x10] sm:$0xff]  ;;  %v1104_v45 = vld [vmem:[#allocation3 + $0x8] sm:$0xff] }
 0x360   : > { %2558 = vmatprep.subr.bf16.mxu0 %v2557_v20  ;;  %v2765_v17 = vpop.eup %2764  ;;  %v1106_v3 = vld [vmem:[#allocation3 + $0x18] sm:$0xff]  ;;  %v1107_v4 = vld [vmem:[#allocation3 + $0x20] sm:$0xff]  ;;  %v1108_v9 = vld [vmem:[#allocation3 + $0x28] sm:$0xff] }
 0x361   : > { %1128 = vperm.xlu1 %2755, %v2761_v43   ;;  %v2767_v18 = vpop.eup %2766  ;;  %v1109_v10 = vld [vmem:[#allocation3 + $0x30] sm:$0xff]  ;;  %v1110_v29 = vld [vmem:[#allocation3 + $0x38] sm:$0xff] }
 0x362   : > { %1118 = vperm.xlu0 %2754, %v2763_v38   ;;  %2528 = vmatpush3.bf16.msra.mxu1 %v2525_v25  ;;  %v2769_v53 = vpop.eup %2768 }
 0x363   : > { %2560 = vmatpush3.bf16.msra.mxu0 %v2557_v20  ;;  %2530 = vmatprep.subr.bf16.mxu1 %v2529_v40  ;;  %v2771_v51 = vpop.eup %2770 }
 0x364   : > { %2562 = vmatprep.subr.bf16.mxu0 %v2561_v47 }
 0x365   : > { %1138 = vperm.xlu1 %2755, %v2765_v17  }
 0x366   : > { %1133 = vperm.xlu0 %2754, %v2767_v18   ;;  %2532 = vmatpush3.bf16.msra.mxu1 %v2529_v40 }
 0x367   : > { %2564 = vmatpush3.bf16.msra.mxu0 %v2561_v47  ;;  %2534 = vmatprep.subr.bf16.mxu1 %v2533_v19  ;;  %v2022_v47 = vld [vmem:[%s3264_s17] ss:$0 sm:$0xff] }
 0x368   : > { %2566 = vmatprep.subr.bf16.mxu0 %v2565_v22 }
 0x369   : > { %1148 = vperm.xlu1 %2755, %v2769_v53  }
 0x36a   : > { %1143 = vperm.xlu0 %2754, %v2771_v51   ;;  %2536 = vmatpush3.bf16.msra.mxu1 %v2533_v19 }
 0x36b   : > { %2568 = vmatpush3.bf16.msra.mxu0 %v2565_v22  ;;  %2538 = vmatprep.subr.bf16.mxu1 %v2537_v55 }
 0x36c   : > { %2570 = vmatprep.subr.bf16.mxu0 %v2569_v56 }
 0x36e   : > { %2540 = vmatpush3.bf16.msra.mxu1 %v2537_v55 }
 0x36f   : > { %2572 = vmatpush3.bf16.msra.mxu0 %v2569_v56  ;;  %2542 = vmatprep.subr.bf16.mxu1 %v2541_v15 }
 0x370   : > { %2574 = vmatprep.subr.bf16.mxu0 %v2573_v21 }
 0x372   : > { %2544 = vmatpush3.bf16.msra.mxu1 %v2541_v15 }
 0x373   : > { %2576 = vmatpush3.bf16.msra.mxu0 %v2573_v21 }
 0x375   : > { %2322 = vmatmul.mubr.f32.vlgmr.msra.gmra.mrb[0].mxu1 %v1176_v24 }
 0x376   : > { %2324 = vmatprep.mubr.f32.mxu1 %v1177_v31 }
 0x379   : > { %2325 = vmatmul.mubr.f32.gmra.mrb[2].mxu1 %v1178_v36 }
 0x37a   : > { %2327 = vmatprep.mubr.f32.mxu1 %v1179_v39 }
 0x37d   : > { %2328 = vmatmul.mubr.f32.gmra.mrb[4].mxu1 %v1180_v60 }
 0x37e   : > { %2330 = vmatprep.mubr.f32.mxu1 %v1181_v42 }
 0x381   : > { %2331 = vmatmul.mubr.f32.gmra.mrb[6].mxu1 %v1182_v61 }
 0x3dc   : > { %v1124_v63 = vpop.permute.xlu1 %1123 }
 0x3dd   : > { %v1114_v27 = vpop.permute.xlu0 %1113  ;;  %v1153_v30 = vmul.f32 %v1124_v63, %v1105_v0 }
 0x3de   : > { %v1151_v1 = vmul.f32 %v1114_v27, %v1103_v62 }
 0x3e0   : > { %2365 = vmatprep.mubr.f32.mxu0 %v1151_v1  ;;  %v1129_v28 = vpop.permute.xlu1 %1128 }
 0x3e1   : > { %v1119_v2 = vpop.permute.xlu0 %1118  ;;  %v1154_v7 = vmul.f32 %v1129_v28, %v1106_v3 }
 0x3e2   : > { %v1152_v26 = vmul.f32 %v1119_v2, %v1104_v45 }
 0x3e4   : > { %2366 = vmatmul.mubr.f32.vlgmr.msra.gmra.mrb[0].mxu0 %v1152_v26  ;;  %v1139_v5 = vpop.permute.xlu1 %1138 }
 0x3e5   : > { %2368 = vmatprep.mubr.f32.mxu0 %v1153_v30  ;;  %v1134_v6 = vpop.permute.xlu0 %1133  ;;  %v1156_v12 = vmul.f32 %v1139_v5, %v1108_v9 }
 0x3e6   : > { %v1155_v8 = vmul.f32 %v1134_v6, %v1107_v4 }
 0x3e8   : > { %2369 = vmatmul.mubr.f32.gmra.mrb[2].mxu0 %v1154_v7  ;;  %v1149_v25 = vpop.permute.xlu1 %1148 }
 0x3e9   : > { %2371 = vmatprep.mubr.f32.mxu0 %v1155_v8  ;;  %v1144_v11 = vpop.permute.xlu0 %1143  ;;  %v1158_v33 = vmul.f32 %v1149_v25, %v1110_v29 }
 0x3ea   : > { %v1157_v13 = vmul.f32 %v1144_v11, %v1109_v10 }
 0x3ec   : > { %2372 = vmatmul.mubr.f32.gmra.mrb[4].mxu0 %v1156_v12 }
 0x3ed   : > { %2374 = vmatprep.mubr.f32.mxu0 %v1157_v13 }
 0x3f0   : > { %2375 = vmatmul.mubr.f32.gmra.mrb[6].mxu0 %v1158_v33 }
 0x448   : > { %v2323_v20 = vpop.f32.mrb[0].mxu1 }
 0x449   : > { %v1265_v32 = vpop.f32.mrb[1].mxu1 }
 0x44c   : > { %v2326_v34 = vpop.f32.mrb[2].mxu1 }
 0x44d   : > { %v1275_v35 = vpop.f32.mrb[3].mxu1 }
 0x450   : > { %v2329_v37 = vpop.f32.mrb[4].mxu1 }
 0x451   : > { %v1285_v41 = vpop.f32.mrb[5].mxu1 }
 0x454   : > { %v2332_v43 = vpop.f32.mrb[6].mxu1 }
 0x455   : > { %v1295_v38 = vpop.f32.mrb[7].mxu1 }
 0x4b7   : > { %v2367_v40 = vpop.f32.mrb[0].mxu0 }
 0x4b8   : > { %v1376_v48 = vadd.f32 %v2367_v40, %v2323_v20  ;;  %v1370_v44 = vpop.f32.mrb[1].mxu0 }
 0x4b9   : > { %v1371_v46 = vadd.f32 %v1370_v44, %v1265_v32 }
 0x4ba   : > { %v1417_v14 = vadd.f32 %v2022_v47, %v1376_v48 }
 0x4bb   : > { %v1416_v16 = vadd.f32 %v2022_v47, %v1371_v46  ;;  %v2370_v17 = vpop.f32.mrb[2].mxu0 }
 0x4bc   : > { %v1425_v18 = vmax.f32 %v1417_v14, 0.0  ;;  %v1386_v19 = vadd.f32 %v2370_v17, %v2326_v34  ;;  %v1380_v22 = vpop.f32.mrb[3].mxu0 }
 0x4bd   : > { %v1424_v23 = vmax.f32 %v1416_v16, 0.0  ;;  %v1381_v49 = vadd.f32 %v1380_v22, %v1275_v35 }
 0x4be   : > { %1433 = vst [vmem:[#allocation2 + $0x8] sm:$0xff] %v1425_v18  ;;  %v1419_v50 = vadd.f32 %v2022_v47, %v1386_v19 }
 0x4bf   : > { %1432 = vst [vmem:[#allocation2] sm:$0xff] %v1424_v23  ;;  %v1418_v52 = vadd.f32 %v2022_v47, %v1381_v49  ;;  %v2373_v53 = vpop.f32.mrb[4].mxu0 }
 0x4c0   : > { %v1427_v51 = vmax.f32 %v1419_v50, 0.0  ;;  %v1396_v55 = vadd.f32 %v2373_v53, %v2329_v37  ;;  %v1390_v56 = vpop.f32.mrb[5].mxu0 }
 0x4c1   : > { %v1426_v54 = vmax.f32 %v1418_v52, 0.0  ;;  %v1391_v58 = vadd.f32 %v1390_v56, %v1285_v41 }
 0x4c2   : > { %1435 = vst [vmem:[#allocation2 + $0x18] sm:$0xff] %v1427_v51  ;;  %v1421_v59 = vadd.f32 %v2022_v47, %v1396_v55 }
 0x4c3   : > { %1434 = vst [vmem:[#allocation2 + $0x10] sm:$0xff] %v1426_v54  ;;  %v1420_v57 = vadd.f32 %v2022_v47, %v1391_v58  ;;  %v2376_v15 = vpop.f32.mrb[6].mxu0 }
 0x4c4   : > { %v1429_v21 = vmax.f32 %v1421_v59, 0.0  ;;  %v1406_v24 = vadd.f32 %v2376_v15, %v2332_v43  ;;  %v1400_v31 = vpop.f32.mrb[7].mxu0 }
 0x4c5   : > { %v1428_v36 = vmax.f32 %v1420_v57, 0.0  ;;  %v1401_v39 = vadd.f32 %v1400_v31, %v1295_v38 }
 0x4c6   : > { %1437 = vst [vmem:[#allocation2 + $0x28] sm:$0xff] %v1429_v21  ;;  %v1423_v60 = vadd.f32 %v2022_v47, %v1406_v24 }
 0x4c7   : > { %1436 = vst [vmem:[#allocation2 + $0x20] sm:$0xff] %v1428_v36  ;;  %v1422_v42 = vadd.f32 %v2022_v47, %v1401_v39 }
 0x4c8   : > { %v1431_v61 = vmax.f32 %v1423_v60, 0.0 }
 0x4c9   : > { %v1430_v62 = vmax.f32 %v1422_v42, 0.0 }
 0x4ca   : > { %1439 = vst [vmem:[#allocation2 + $0x38] sm:$0xff] %v1431_v61 }
 0x4cb   : > { %1438 = vst [vmem:[#allocation2 + $0x30] sm:$0xff] %v1430_v62 }
 0x4cc PF: > { %p1440_p12 = scmp.eq.s32.totalorder %s2986_s21, 1 }
 0x4cd   : > { %v1447_v63 = vld [vmem:[#allocation4 + $0x10] sm:$0xff] (%p1440_p12)  ;;  %v1445_v27 = vld [vmem:[#allocation4] sm:$0xff] (%p1440_p12)  ;;  %v1448_v0 = vld [vmem:[#allocation4 + $0x18] sm:$0xff] (%p1440_p12)  ;;  %v3006_v1 = vmov (%p1440_p12), 0  }
 0x4ce   : > { %1444 = sbr.rel (!%p1440_p12) target bundleno = 1608 (0x648), region = 76  ;;  %2773 = vset.pattern.permute.xlu1 (%p1440_p12), %v3006_v1  ;;  %2772 = vset.pattern.permute.xlu0 (%p1440_p12), %v3006_v1  ;;  %v1455_v45 = vmax.f32 (%p1440_p12), %v1447_v63, 1.0  ;;  %v1453_v28 = vmax.f32 (%p1440_p12), %v1445_v27, 1.0  ;;  %v1456_v30 = vmax.f32 (%p1440_p12), %v1448_v0, 1.0  ;;  %v1446_v2 = vld [vmem:[#allocation4 + $0x8] sm:$0xff] (%p1440_p12)  ;;  %v1449_v4 = vld [vmem:[#allocation4 + $0x20] sm:$0xff] (%p1440_p12) }
 0x4cf   : > { %v1454_v26 = vmax.f32 (%p1440_p12), %v1446_v2, 1.0  ;;  %v1450_v3 = vld [vmem:[#allocation4 + $0x28] sm:$0xff] (%p1440_p12)  ;;  %v1559_v11 = vld [vmem:[%s3266_s14 + $0x10] sm:$0xff] (%p1440_p12)  ;;  %v1560_v12 = vld [vmem:[%s3266_s14 + $0x18] sm:$0xff] (%p1440_p12)  ;;  %v1457_v34 = vmax.f32 (%p1440_p12), %v1449_v4, 1.0 }
 0x4d0   : > { %v1557_v5 = vld [vmem:[%s3266_s14] sm:$0xff] (%p1440_p12)  ;;  %2774 = vrcp.f32 (%p1440_p12), %v1455_v45  ;;  %v1558_v6 = vld [vmem:[%s3266_s14 + $0x8] sm:$0xff] (%p1440_p12)  ;;  %v1535_v13 = vld [vmem:[%s3252_s10 + $0x10] sm:$0xff] (%p1440_p12)  ;;  %v1458_v29 = vmax.f32 (%p1440_p12), %v1450_v3, 1.0  ;;  %v2581_v25 = vpack.c.bf16 (%p1440_p12), %v1560_v12, %v1559_v11 }
 0x4d1   : > { %v1533_v7 = vld [vmem:[%s3252_s10] sm:$0xff] (%p1440_p12)  ;;  %v1534_v8 = vld [vmem:[%s3252_s10 + $0x8] sm:$0xff] (%p1440_p12)  ;;  %2776 = vrcp.f32 (%p1440_p12), %v1453_v28  ;;  %v2577_v9 = vpack.c.bf16 (%p1440_p12), %v1558_v6, %v1557_v5  ;;  %v1536_v33 = vld [vmem:[%s3252_s10 + $0x18] sm:$0xff] (%p1440_p12) }
 0x4d2   : > { %v2609_v10 = vpack.c.bf16 (%p1440_p12), %v1534_v8, %v1533_v7  ;;  %2778 = vrcp.f32 (%p1440_p12), %v1456_v30  ;;  %v1561_v20 = vld [vmem:[%s3266_s14 + $0x20] sm:$0xff] (%p1440_p12)  ;;  %v1562_v32 = vld [vmem:[%s3266_s14 + $0x28] sm:$0xff] (%p1440_p12)  ;;  %v1452_v35 = vld [vmem:[#allocation4 + $0x38] sm:$0xff] (%p1440_p12)  ;;  %v2613_v37 = vpack.c.bf16 (%p1440_p12), %v1536_v33, %v1535_v13 }
 0x4d3   : > { %2780 = vrcp.f32 (%p1440_p12), %v1454_v26  ;;  %2578 = vmatprep.subr.bf16.mxu1 (%p1440_p12), %v2577_v9  ;;  %v1537_v41 = vld [vmem:[%s3252_s10 + $0x20] sm:$0xff] (%p1440_p12)  ;;  %v1538_v43 = vld [vmem:[%s3252_s10 + $0x28] sm:$0xff] (%p1440_p12)  ;;  %v2585_v40 = vpack.c.bf16 (%p1440_p12), %v1562_v32, %v1561_v20  ;;  %v1460_v48 = vmax.f32 (%p1440_p12), %v1452_v35, 1.0  ;;  %v1563_v44 = vld [vmem:[%s3266_s14 + $0x30] sm:$0xff] (%p1440_p12) }
 0x4d4   : > { %2610 = vmatprep.subr.bf16.mxu0 (%p1440_p12), %v2609_v10  ;;  %v1451_v38 = vld [vmem:[#allocation4 + $0x30] sm:$0xff] (%p1440_p12)  ;;  %2580 = vmatpush3.bf16.msra.mxu1 (%p1440_p12), %v2577_v9  ;;  %v2617_v47 = vpack.c.bf16 (%p1440_p12), %v1538_v43, %v1537_v41  ;;  %2782 = vrcp.f32 (%p1440_p12), %v1458_v29  ;;  %v1564_v46 = vld [vmem:[%s3266_s14 + $0x38] sm:$0xff] (%p1440_p12)  ;;  %v1565_v23 = vld [vmem:[%s3266_s14 + $0x40] sm:$0xff] (%p1440_p12) }
 0x4d5   : > { %2612 = vmatpush3.bf16.msra.mxu0 %v2609_v10  ;;  %2582 = vmatprep.subr.bf16.mxu1 %v2581_v25  ;;  %2784 = vrcp.f32 %v1457_v34  ;;  %v1459_v14 = vmax.f32 %v1451_v38, 1.0  ;;  %v1539_v16 = vld [vmem:[%s3252_s10 + $0x30] sm:$0xff]  ;;  %v1540_v17 = vld [vmem:[%s3252_s10 + $0x38] sm:$0xff]  ;;  %v2589_v18 = vpack.c.bf16 %v1564_v46, %v1563_v44  ;;  %v1566_v49 = vld [vmem:[%s3266_s14 + $0x48] sm:$0xff] }
 0x4d6   : > { %2614 = vmatprep.subr.bf16.mxu0 %v2613_v37  ;;  %2786 = vrcp.f32 %v1460_v48  ;;  %v2621_v22 = vpack.c.bf16 %v1540_v17, %v1539_v16  ;;  %v1541_v52 = vld [vmem:[%s3252_s10 + $0x40] sm:$0xff]  ;;  %v1542_v53 = vld [vmem:[%s3252_s10 + $0x48] sm:$0xff]  ;;  %v2593_v56 = vpack.c.bf16 %v1566_v49, %v1565_v23  ;;  %v1567_v58 = vld [vmem:[%s3266_s14 + $0x50] sm:$0xff] }
 0x4d7   : > { %2788 = vrcp.f32 %v1459_v14  ;;  %v2625_v54 = vpack.c.bf16 %v1542_v53, %v1541_v52  ;;  %v1568_v59 = vld [vmem:[%s3266_s14 + $0x58] sm:$0xff]  ;;  %v1543_v57 = vld [vmem:[%s3252_s10 + $0x50] sm:$0xff]  ;;  %v1569_v60 = vld [vmem:[%s3266_s14 + $0x60] sm:$0xff] }
 0x4d8   : > { %2584 = vmatpush3.bf16.msra.mxu1 %v2581_v25  ;;  %v1544_v15 = vld [vmem:[%s3252_s10 + $0x58] sm:$0xff]  ;;  %v2597_v36 = vpack.c.bf16 %v1568_v59, %v1567_v58  ;;  %v1570_v42 = vld [vmem:[%s3266_s14 + $0x68] sm:$0xff]  ;;  %v1545_v61 = vld [vmem:[%s3252_s10 + $0x60] sm:$0xff] }
 0x4d9   : > { %2616 = vmatpush3.bf16.msra.mxu0 %v2613_v37  ;;  %2586 = vmatprep.subr.bf16.mxu1 %v2585_v40  ;;  %v1549_v21 = vld [vmem:[#allocation2] sm:$0xff]  ;;  %v2629_v39 = vpack.c.bf16 %v1544_v15, %v1543_v57  ;;  %v1546_v62 = vld [vmem:[%s3252_s10 + $0x68] sm:$0xff]  ;;  %v2601_v0 = vpack.c.bf16 %v1570_v42, %v1569_v60  ;;  %v1571_v45 = vld [vmem:[%s3266_s14 + $0x70] sm:$0xff] }
 0x4da   : > { %2618 = vmatprep.subr.bf16.mxu0 %v2617_v47  ;;  %v2775_v19 = vpop.eup %2774  ;;  %2409 = vmatprep.mubr.f32.mxu1 %v1549_v21  ;;  %v2633_v1 = vpack.c.bf16 %v1546_v62, %v1545_v61  ;;  %v1572_v28 = vld [vmem:[%s3266_s14 + $0x78] sm:$0xff]  ;;  %v1547_v30 = vld [vmem:[%s3252_s10 + $0x70] sm:$0xff]  ;;  %v1550_v4 = vld [vmem:[#allocation2 + $0x8] sm:$0xff] }
 0x4db   : > { %v2777_v50 = vpop.eup %2776  ;;  %1497 = vperm.xlu1 %2773, %v2775_v19   ;;  %v1548_v2 = vld [vmem:[%s3252_s10 + $0x78] sm:$0xff]  ;;  %v2605_v26 = vpack.c.bf16 %v1572_v28, %v1571_v45  ;;  %v1551_v5 = vld [vmem:[#allocation2 + $0x10] sm:$0xff]  ;;  %v1554_v8 = vld [vmem:[#allocation2 + $0x28] sm:$0xff] }
 0x4dc   : > { %v2779_v51 = vpop.eup %2778  ;;  %1487 = vperm.xlu0 %2772, %v2777_v50   ;;  %2588 = vmatpush3.bf16.msra.mxu1 %v2585_v40  ;;  %v2637_v3 = vpack.c.bf16 %v1548_v2, %v1547_v30  ;;  %v1552_v6 = vld [vmem:[#allocation2 + $0x18] sm:$0xff]  ;;  %v1553_v7 = vld [vmem:[#allocation2 + $0x20] sm:$0xff]  ;;  %v1555_v9 = vld [vmem:[#allocation2 + $0x30] sm:$0xff] }
 0x4dd   : > { %v2781_v55 = vpop.eup %2780  ;;  %2620 = vmatpush3.bf16.msra.mxu0 %v2617_v47  ;;  %2590 = vmatprep.subr.bf16.mxu1 %v2589_v18  ;;  %v1556_v10 = vld [vmem:[#allocation2 + $0x38] sm:$0xff]  ;;  %v1477_v11 = vld [vmem:[#allocation3] sm:$0xff]  ;;  %v1479_v29 = vld [vmem:[#allocation3 + $0x10] sm:$0xff] }
 0x4de   : > { %2622 = vmatprep.subr.bf16.mxu0 %v2621_v22  ;;  %v2783_v24 = vpop.eup %2782  ;;  %v1478_v33 = vld [vmem:[#allocation3 + $0x8] sm:$0xff]  ;;  %v1480_v37 = vld [vmem:[#allocation3 + $0x18] sm:$0xff]  ;;  %v1481_v41 = vld [vmem:[#allocation3 + $0x20] sm:$0xff] }
 0x4df   : > { %1502 = vperm.xlu1 %2773, %v2779_v51   ;;  %v2785_v31 = vpop.eup %2784  ;;  %v1482_v48 = vld [vmem:[#allocation3 + $0x28] sm:$0xff]  ;;  %v1483_v44 = vld [vmem:[#allocation3 + $0x30] sm:$0xff]  ;;  %v1484_v17 = vld [vmem:[#allocation3 + $0x38] sm:$0xff] }
 0x4e0   : > { %1492 = vperm.xlu0 %2772, %v2781_v55   ;;  %2592 = vmatpush3.bf16.msra.mxu1 %v2589_v18  ;;  %v2787_v63 = vpop.eup %2786 }
 0x4e1   : > { %2624 = vmatpush3.bf16.msra.mxu0 %v2621_v22  ;;  %2594 = vmatprep.subr.bf16.mxu1 %v2593_v56  ;;  %v2789_v27 = vpop.eup %2788 }
 0x4e2   : > { %2626 = vmatprep.subr.bf16.mxu0 %v2625_v54 }
 0x4e3   : > { %1512 = vperm.xlu1 %2773, %v2783_v24  }
 0x4e4   : > { %1507 = vperm.xlu0 %2772, %v2785_v31   ;;  %2596 = vmatpush3.bf16.msra.mxu1 %v2593_v56 }
 0x4e5   : > { %2628 = vmatpush3.bf16.msra.mxu0 %v2625_v54  ;;  %2598 = vmatprep.subr.bf16.mxu1 %v2597_v36  ;;  %v2024_v54 = vld [vmem:[%s3264_s17] ss:$0 sm:$0xff] }
 0x4e6   : > { %2630 = vmatprep.subr.bf16.mxu0 %v2629_v39 }
 0x4e7   : > { %1522 = vperm.xlu1 %2773, %v2787_v63  }
 0x4e8   : > { %1517 = vperm.xlu0 %2772, %v2789_v27   ;;  %2600 = vmatpush3.bf16.msra.mxu1 %v2597_v36 }
 0x4e9   : > { %2632 = vmatpush3.bf16.msra.mxu0 %v2629_v39  ;;  %2602 = vmatprep.subr.bf16.mxu1 %v2601_v0 }
 0x4ea   : > { %2634 = vmatprep.subr.bf16.mxu0 %v2633_v1 }
 0x4ec   : > { %2604 = vmatpush3.bf16.msra.mxu1 %v2601_v0 }
 0x4ed   : > { %2636 = vmatpush3.bf16.msra.mxu0 %v2633_v1  ;;  %2606 = vmatprep.subr.bf16.mxu1 %v2605_v26 }
 0x4ee   : > { %2638 = vmatprep.subr.bf16.mxu0 %v2637_v3 }
 0x4f0   : > { %2608 = vmatpush3.bf16.msra.mxu1 %v2605_v26 }
 0x4f1   : > { %2640 = vmatpush3.bf16.msra.mxu0 %v2637_v3 }
 0x4f3   : > { %2410 = vmatmul.mubr.f32.vlgmr.msra.gmra.mrb[0].mxu1 %v1550_v4 }
 0x4f4   : > { %2412 = vmatprep.mubr.f32.mxu1 %v1551_v5 }
 0x4f7   : > { %2413 = vmatmul.mubr.f32.gmra.mrb[2].mxu1 %v1552_v6 }
 0x4f8   : > { %2415 = vmatprep.mubr.f32.mxu1 %v1553_v7 }
 0x4fb   : > { %2416 = vmatmul.mubr.f32.gmra.mrb[4].mxu1 %v1554_v8 }
 0x4fc   : > { %2418 = vmatprep.mubr.f32.mxu1 %v1555_v9 }
 0x4ff   : > { %2419 = vmatmul.mubr.f32.gmra.mrb[6].mxu1 %v1556_v10 }
 0x55a   : > { %v1498_v12 = vpop.permute.xlu1 %1497 }
 0x55b   : > { %v1488_v13 = vpop.permute.xlu0 %1487  ;;  %v1527_v32 = vmul.f32 %v1498_v12, %v1479_v29 }
 0x55c   : > { %v1525_v25 = vmul.f32 %v1488_v13, %v1477_v11 }
 0x55e   : > { %2453 = vmatprep.mubr.f32.mxu0 %v1525_v25  ;;  %v1503_v20 = vpop.permute.xlu1 %1502 }
 0x55f   : > { %v1493_v34 = vpop.permute.xlu0 %1492  ;;  %v1528_v40 = vmul.f32 %v1503_v20, %v1480_v37 }
 0x560   : > { %v1526_v35 = vmul.f32 %v1493_v34, %v1478_v33 }
 0x562   : > { %2454 = vmatmul.mubr.f32.vlgmr.msra.gmra.mrb[0].mxu0 %v1526_v35  ;;  %v1513_v43 = vpop.permute.xlu1 %1512 }
 0x563   : > { %2456 = vmatprep.mubr.f32.mxu0 %v1527_v32  ;;  %v1508_v38 = vpop.permute.xlu0 %1507  ;;  %v1530_v14 = vmul.f32 %v1513_v43, %v1482_v48 }
 0x564   : > { %v1529_v47 = vmul.f32 %v1508_v38, %v1481_v41 }
 0x566   : > { %2457 = vmatmul.mubr.f32.gmra.mrb[2].mxu0 %v1528_v40  ;;  %v1523_v18 = vpop.permute.xlu1 %1522 }
 0x567   : > { %2459 = vmatprep.mubr.f32.mxu0 %v1529_v47  ;;  %v1518_v46 = vpop.permute.xlu0 %1517  ;;  %v1532_v19 = vmul.f32 %v1523_v18, %v1484_v17 }
 0x568   : > { %v1531_v16 = vmul.f32 %v1518_v46, %v1483_v44 }
 0x56a   : > { %2460 = vmatmul.mubr.f32.gmra.mrb[4].mxu0 %v1530_v14 }
 0x56b   : > { %2462 = vmatprep.mubr.f32.mxu0 %v1531_v16 }
 0x56e   : > { %2463 = vmatmul.mubr.f32.gmra.mrb[6].mxu0 %v1532_v19 }
 0x5c6   : > { %v2411_v22 = vpop.f32.mrb[0].mxu1 }
 0x5c7   : > { %v1639_v23 = vpop.f32.mrb[1].mxu1 }
 0x5ca   : > { %v2414_v49 = vpop.f32.mrb[2].mxu1 }
 0x5cb   : > { %v1649_v50 = vpop.f32.mrb[3].mxu1 }
 0x5ce   : > { %v2417_v52 = vpop.f32.mrb[4].mxu1 }
 0x5cf   : > { %v1659_v53 = vpop.f32.mrb[5].mxu1 }
 0x5d2   : > { %v2420_v51 = vpop.f32.mrb[6].mxu1 }
 0x5d3   : > { %v1669_v55 = vpop.f32.mrb[7].mxu1 }
 0x635   : > { %v2455_v56 = vpop.f32.mrb[0].mxu0 }
 0x636   : > { %v1750_v58 = vadd.f32 %v2455_v56, %v2411_v22  ;;  %v1744_v59 = vpop.f32.mrb[1].mxu0 }
 0x637   : > { %v1745_v57 = vadd.f32 %v1744_v59, %v1639_v23 }
 0x638   : > { %v1791_v15 = vadd.f32 %v2024_v54, %v1750_v58 }
 0x639   : > { %v1790_v21 = vadd.f32 %v2024_v54, %v1745_v57  ;;  %v2458_v24 = vpop.f32.mrb[2].mxu0 }
 0x63a   : > { %1799 = vst [vmem:[#allocation12 + $0x8] sm:$0xff] %v1791_v15  ;;  %v1760_v31 = vadd.f32 %v2458_v24, %v2414_v49  ;;  %v1754_v36 = vpop.f32.mrb[3].mxu0 }
 0x63b   : > { %1798 = vst [vmem:[#allocation12] sm:$0xff] %v1790_v21  ;;  %v1755_v39 = vadd.f32 %v1754_v36, %v1649_v50 }
 0x63c   : > { %v1793_v60 = vadd.f32 %v2024_v54, %v1760_v31 }
 0x63d   : > { %v1792_v42 = vadd.f32 %v2024_v54, %v1755_v39  ;;  %v2461_v61 = vpop.f32.mrb[4].mxu0 }
 0x63e   : > { %1801 = vst [vmem:[#allocation12 + $0x18] sm:$0xff] %v1793_v60  ;;  %v1770_v62 = vadd.f32 %v2461_v61, %v2417_v52  ;;  %v1764_v63 = vpop.f32.mrb[5].mxu0 }
 0x63f   : > { %1800 = vst [vmem:[#allocation12 + $0x10] sm:$0xff] %v1792_v42  ;;  %v1765_v27 = vadd.f32 %v1764_v63, %v1659_v53 }
 0x640   : > { %v1795_v0 = vadd.f32 %v2024_v54, %v1770_v62 }
 0x641   : > { %v1794_v1 = vadd.f32 %v2024_v54, %v1765_v27  ;;  %v2464_v45 = vpop.f32.mrb[6].mxu0 }
 0x642   : > { %1803 = vst [vmem:[#allocation12 + $0x28] sm:$0xff] %v1795_v0  ;;  %v1780_v28 = vadd.f32 %v2464_v45, %v2420_v51  ;;  %v1774_v30 = vpop.f32.mrb[7].mxu0 }
 0x643   : > { %1802 = vst [vmem:[#allocation12 + $0x20] sm:$0xff] %v1794_v1  ;;  %v1775_v2 = vadd.f32 %v1774_v30, %v1669_v55 }
 0x644   : > { %v1797_v26 = vadd.f32 %v2024_v54, %v1780_v28 }
 0x645   : > { %v1796_v3 = vadd.f32 %v2024_v54, %v1775_v2 }
 0x646   : > { %1805 = vst [vmem:[#allocation12 + $0x38] sm:$0xff] %v1797_v26 }
 0x647   : > { %1804 = vst [vmem:[#allocation12 + $0x30] sm:$0xff] %v1796_v3 }
 0x648 PF: > { %p2692_p2 = scmp.eq.s32.totalorder %s3069_s24, 1  ;;  %s3007_s21 = smov [#allocation12]  }
 0x649   : > { %s1812_s26 = sshll.u32 %s3007_s21, 4  ;;  %s1813_s26 = int_to_ptr.vmem [resolvable:$true] %s1812_s26 }
 0x64a   : > { %s2906_s29 = scalar_lea.vmem %s1813_s26, 1024  ;;  %p2913_p10 = scmp.lt.s32.totalorder %s1813_s26, %s1813_s26 }
 0x64b   : > { %p2907_p9 = scmp.ne.s32.totalorder %s1813_s26, %s2906_s29  ;;  %p2914_p11 = scmp.lt.s32.totalorder %s2906_s29, %s2906_s29 }
 0x64d   : > { %p2908_p3 = pnand %p2907_p9, %p2692_p2  ;;  %p2915_p8 = por %p2914_p11, %p2913_p10 }
 0x64f   : > { %p2909_p6 = pneg %p2908_p3 }
 0x651   : > { %p2916_p1 = pnand %p2915_p8, %p2909_p6 }
 0x653   : > { %2919 = shalt.err (!%p2916_p1)
}
 0x654   : > { %s2920_s18 = scalar_lea.hbm %s3697_s5, 1024 }
 0x655   : > { %p2921_p4 = scmp.ne.s32.totalorder %s3697_s5, %s2920_s18  ;;  %p2926_p7 = scmp.lt.u32.totalorder %s2920_s18, %s3697_s5 }
 0x657   : > { %p2922_p13 = pnand %p2921_p4, %p2692_p2 }
 0x659   : > { %p2923_p5 = pneg %p2922_p13 }
 0x65b   : > { %p2928_p0 = pnand %p2926_p7, %p2923_p5 }
 0x65d   : > { %2931 = shalt.err (!%p2928_p0)
}
 0x65e   : > { %s3008_s13 = smov 128   ;;  %s3009_s7 = smov 8  }
 0x65f   : > { %2670 = dma.vmem_to_hbm [thread:$0]  (%p2692_p2), %s1813_s26, 1024, %s3697_s5, [#allocation7], %s3008_s13, %s3008_s13, %s3009_s7  }
 0x660   : > { %2969 = dma.done.wait (%p2692_p2), [#allocation7], 1024  }
 0x661   : > { %2971 = vsyncadd (%p2692_p2), [#allocation7], 4294966272 }
 0x662 PF: > { %s18_s23 = sadd.s32 1, %s2994_s23   ;;  %s3728_s16 = sld [smem:[#allocation18_spill]] }
 0x663   : > { %p15_p12 = scmp.ge.s32.totalorder %s18_s23, 4   ;;  %s3729_s27 = sld [smem:[#allocation17_spill]] }
 0x664   : > { %s3730_s18 = smov %s2978_s19  ;;  %s3731_s19 = smov %s2982_s20 }
 0x665   : > { %s3733_s21 = smov %s2990_s22  ;;  %17 = sbr.rel (!%p15_p12) target bundleno = 8 (0x8), region = 120 }
 0x668   : > { %s3732_s20 = smov %s3728_s16 }
 0x669   : > { %s3734_s22 = smov %s3729_s27 }
 0x66c   :  { %1828 = vsyncpa [#allocation6], 1 }
 0x66d   :  { %1830 = vsyncpa [#allocation6 + $0x1], 1 }
 0x66e   :  { %1831 = vsyncpa [#allocation9], 1 }
 0x66f   :  { %1832 = vsyncpa [#allocation7], 1 }
 0x670   :  { %1834 = vsyncpa [#allocation7 + $0x1], 1 }

</bundles_post_ra>
